<compile_context>
chip_gen: v7x
topology: tpu7x:2x2x1
jax: 0.10.0
libtpu: 0.0.40
codegen_flags: <defaults>
</compile_context>

<pallas_src>
import functools

import numpy as np
import jax
import jax.numpy as jnp
from jax import lax
from jax.experimental import pallas as pl
from jax.experimental.pallas import tpu as pltpu


def _patch_embed_kernel(x_ref, w_ref, b_ref, o_ref):
    # x_ref: (tm, Kp) streamed patch rows (bf16 or f32)
    # w_ref: (Kp, N)  fully resident weight, canonical (K, N) orientation
    # b_ref: (1,  N)  resident bias (f32)
    # o_ref: (tm, N)  full-N lane-dense output tile
    acc = jnp.dot(x_ref[...], w_ref[...], preferred_element_type=jnp.float32)
    o_ref[...] = (acc + b_ref[...]).astype(o_ref.dtype)


def _choose_tm(M, N, Kp, x_bytes, out_bytes, vmem_budget=40 << 20, max_tm=2048):
    """Largest M-tile that fits the VMEM budget; >=2 blocks when M allows (v7x 2 TCs)."""
    # Resident weight (counted double-buffered to be safe) + bias.
    fixed = 2 * Kp * N * x_bytes + 2 * 8 * N * out_bytes
    # Double-buffered x tile row + output tile row.
    per_row = 2 * Kp * x_bytes + 2 * N * out_bytes
    budget_tm = max(8, int((vmem_budget - fixed) // per_row))
    budget_tm = max(8, min(max_tm, (budget_tm // 8) * 8))
    if M < 16:
        return M  # single full-extent block (allowed even if not a multiple of 8)
    # Split into at least two blocks so both v7x TensorCores are used.
    two_block_tm = (((M + 1) // 2) + 7) // 8 * 8
    return max(8, min(budget_tm, two_block_tm))


def patch_embeddings(x, weight, bias, patch_size, *, compute_dtype=jnp.bfloat16):
    """ViT patch embedding: Conv2d(k=P, stride=P) -> flatten(2) -> transpose(1, 2).

    x: (B, C, H, W); weight: (hidden, C, P, P) [OIHW]; bias: (hidden,)
    returns: (B, num_patches, hidden) in x.dtype
    """
    B, C, H, W = x.shape
    N = weight.shape[0]
    P = patch_size
    Hp, Wp = H // P, W // P
    num_patches = Hp * Wp
    K = C * P * P
    M = B * num_patches

    if compute_dtype is None:
        compute_dtype = x.dtype
    out_dtype = x.dtype

    # Patch extraction flattened in (C, P, P) order to match the OIHW weight.
    # Cast first (bf16 halves the transpose bytes); the result is materialized as a
    # contiguous (M, K) slab so the kernel's x DMA is sequential, not a strided gather.
    xp = x.astype(compute_dtype).reshape(B, C, Hp, P, Wp, P)
    xp = jnp.transpose(xp, (0, 2, 4, 1, 3, 5)).reshape(M, K)

    # One-time weight transpose to (K, N): canonical MXU contraction in-kernel,
    # no per-tile XLU transposes competing with vmatmul pushes.
    w = weight.reshape(N, K).T.astype(compute_dtype)
    b = bias.reshape(1, N).astype(jnp.float32)

    # Zero-pad K up to a lane-tile multiple (exact; padded terms are zero).
    Kp = ((K + 127) // 128) * 128
    if Kp != K:
        xp = jnp.pad(xp, ((0, 0), (0, Kp - K)))
        w = jnp.pad(w, ((0, Kp - K), (0, 0)))

    tm = _choose_tm(M, N, Kp,
                    np.dtype(compute_dtype).itemsize,
                    np.dtype(out_dtype).itemsize)
    grid = (pl.cdiv(M, tm),)

    out = pl.pallas_call(
        _patch_embed_kernel,
        out_shape=jax.ShapeDtypeStruct((M, N), out_dtype),
        grid=grid,
        in_specs=[
            pl.BlockSpec((tm, Kp), lambda i: (i, 0)),   # streamed patch rows
            pl.BlockSpec((Kp, N), lambda i: (0, 0)),    # fully resident weight
            pl.BlockSpec((1, N), lambda i: (0, 0)),     # resident bias
        ],
        out_specs=pl.BlockSpec((tm, N), lambda i: (i, 0)),  # full-N lane-dense stores
        compiler_params=pltpu.CompilerParams(
            dimension_semantics=("parallel",),
            vmem_limit_bytes=48 << 20,   # tiles budgeted to ~40 MiB; safe on v5e/v6e/v7x
        ),
    )(xp, w, b)

    # (M, N) -> (B, num_patches, hidden)  == conv.flatten(2).transpose(1, 2)
    return out.reshape(B, num_patches, N)


if __name__ == "__main__":
    # Module-default shapes: img=96, patch=16 -> 36 patches, C=3, hidden=512.
    B, C = 2, 3
    img_size, patch_size, hidden_dim = 96, 16, 512

    key = jax.random.PRNGKey(0)
    kx, kw, kb = jax.random.split(key, 3)
    x = jax.random.normal(kx, (B, C, img_size, img_size), dtype=jnp.float32)
    weight = jax.random.normal(
        kw, (hidden_dim, C, patch_size, patch_size), dtype=jnp.float32) * 0.02
    bias = jax.random.normal(kb, (hidden_dim,), dtype=jnp.float32) * 0.02

    # Reference: strided conv (NCHW/OIHW) -> flatten(2) -> transpose(1, 2), as in PyTorch.
    ref = lax.conv_general_dilated(
        x, weight, window_strides=(patch_size, patch_size), padding="VALID",
        dimension_numbers=("NCHW", "OIHW", "NCHW"))
    ref = ref + bias.reshape(1, hidden_dim, 1, 1)
    ref = ref.reshape(B, hidden_dim, -1).transpose(0, 2, 1)

    num_patches = (img_size // patch_size) ** 2

    # f32 feed: tight check against the f32 conv reference.
    f32_fn = jax.jit(functools.partial(patch_embeddings, patch_size=patch_size,
                                       compute_dtype=jnp.float32))
    out_f32 = jax.block_until_ready(f32_fn(x, weight, bias))
    assert out_f32.shape == (B, num_patches, hidden_dim)
    assert jnp.allclose(out_f32, ref, atol=2e-4, rtol=2e-4)

    # Default bf16 feed (f32 accumulation): looser tolerance vs the f32 reference.
    bf16_fn = jax.jit(functools.partial(patch_embeddings, patch_size=patch_size))
    out_bf16 = jax.block_until_ready(bf16_fn(x, weight, bias))
    assert out_bf16.shape == (B, num_patches, hidden_dim)
    assert jnp.allclose(out_bf16, ref, atol=3e-2, rtol=3e-2)

    print("KERNEL_OK")
</pallas_src>

<mosaic_0001>
module attributes {stable_mosaic.version = 11 : i64} {
  func.func @_patch_embed_kernel(%arg0: i32, %arg1: memref<40x768xf32, #tpu.memory_space<vmem>>, %arg2: memref<768x512xf32, #tpu.memory_space<vmem>>, %arg3: memref<1x512xf32, #tpu.memory_space<vmem>>, %arg4: memref<40x512xf32, #tpu.memory_space<vmem>>) attributes {dimension_semantics = [#tpu.dimension_semantics<parallel>], iteration_bounds = array<i64: 2>, scalar_prefetch = 0 : i64, scratch_operands = 0 : i64, tpu.core_type = #tpu.core_type<tc>, window_params = [{transform_indices = @transform_0, window_bounds = array<i64: 40, 768>}, {pipeline_mode = #tpu.pipeline_mode<synchronous>, transform_indices = @transform_1, window_bounds = array<i64: 768, 512>}, {pipeline_mode = #tpu.pipeline_mode<synchronous>, transform_indices = @transform_2, window_bounds = array<i64: 1, 512>}, {transform_indices = @transform_3, window_bounds = array<i64: 40, 512>}]} {
    %c0 = arith.constant 0 : index
    %c0_0 = arith.constant 0 : index
    %0 = vector.load %arg1[%c0, %c0_0] : memref<40x768xf32, #tpu.memory_space<vmem>>, vector<40x768xf32>
    %c0_1 = arith.constant 0 : index
    %c0_2 = arith.constant 0 : index
    %1 = vector.load %arg2[%c0_1, %c0_2] : memref<768x512xf32, #tpu.memory_space<vmem>>, vector<768x512xf32>
    %cst = arith.constant dense<0.000000e+00> : vector<40x512xf32>
    %2 = tpu.matmul %0, %1, %cst {dimension_numbers = #tpu.dot_dimension_numbers<[1], [0], [0], [1], [0, 0, 1, 1], [], []>} : vector<40x768xf32>, vector<768x512xf32>, vector<40x512xf32> -> vector<40x512xf32>
    %c0_3 = arith.constant 0 : index
    %c0_4 = arith.constant 0 : index
    %3 = vector.load %arg3[%c0_3, %c0_4] : memref<1x512xf32, #tpu.memory_space<vmem>>, vector<1x512xf32>
    %4 = vector.broadcast %3 : vector<1x512xf32> to vector<40x512xf32>
    %5 = arith.addf %2, %4 : vector<40x512xf32>
    %c0_5 = arith.constant 0 : index
    %c0_6 = arith.constant 0 : index
    %6 = vector.load %arg4[%c0_5, %c0_6] : memref<40x512xf32, #tpu.memory_space<vmem>>, vector<40x512xf32>
    tpu.vector_store %arg4[%c0_5, %c0_6], %5 {strides = array<i32>} : memref<40x512xf32, #tpu.memory_space<vmem>>, vector<40x512xf32>,
    return
  }
  func.func @transform_0(%arg0: i32) -> (i32, i32) {
    %c0_i32 = arith.constant 0 : i32
    %c0_i32_0 = arith.constant 0 : i32
    return %arg0, %c0_i32 : i32, i32
  }
  func.func @transform_1(%arg0: i32) -> (i32, i32) {
    %c0_i32 = arith.constant 0 : i32
    %c0_i32_0 = arith.constant 0 : i32
    %c0_i32_1 = arith.constant 0 : i32
    return %c0_i32, %c0_i32_0 : i32, i32
  }
  func.func @transform_2(%arg0: i32) -> (i32, i32) {
    %c0_i32 = arith.constant 0 : i32
    %c0_i32_0 = arith.constant 0 : i32
    %c0_i32_1 = arith.constant 0 : i32
    return %c0_i32, %c0_i32_0 : i32, i32
  }
  func.func @transform_3(%arg0: i32) -> (i32, i32) {
    %c0_i32 = arith.constant 0 : i32
    %c0_i32_0 = arith.constant 0 : i32
    return %arg0, %c0_i32 : i32, i32
  }
}

</mosaic_0001>

<bundles_post_ra>
// kernel: patch_embeddings.1
= control target key start
LH: loop header
LB: loop body
LE: loop exit
PB: predicated region body
PF: predicated region fallthrough
CT: control target
= control target key end

     0   :  { %s2098_s12 = smov 0   ;;  %s2100_s13 = smov 0   ;;  %s3476_s0 = inlined_call_operand.vmem [shape: f32[72,768], index: 0, kind: input, shape index: {}]   ;;  %s3477_s1 = inlined_call_operand.vmem [shape: f32[768,512], index: 1, kind: input, shape index: {}]   ;;  %s3478_s2 = inlined_call_operand.vmem [shape: f32[1,512], index: 2, kind: input, shape index: {}]   ;;  %s3479_s3 = inlined_call_operand.vmem [shape: f32[72,512], index: 3, kind: output, shape index: {}]  }
   0x1   :  { %s2102_s14 = smov 0  }
   0x2 LB: > { %s2111_s15 = sadd.s32 4294967295, %s2044_s14   ;;  %s2113_s16 = sadd.s32 1, %s2044_s14   ;;  %s2044_s14 = sphi %s2102_s14, %s3488_s14   ;;  %s2040_s13 = sphi %s2100_s13, %s3487_s13   ;;  %s2036_s12 = sphi %s2098_s12, %s3486_s12  }
   0x3   : > { %s85_s17 = ssub.s32 %s2044_s14, %s2113_s16  ;;  %s88_s18 = sadd.s32 1, %s2040_s13 }
   0x4   : > { %p86_p0 = scmp.eq.s32.totalorder %s85_s17, 0  ;;  %p98_p1 = scmp.ne.s32.totalorder %s2040_s13, %s2036_s12 }
   0x5   : > { %p99_p2 = scmp.eq.s32.totalorder %s2111_s15, 1  ;;  %p1431_p3 = scmp.ge.s32.totalorder %s2044_s14, 1 }
   0x6   : > { %s2121_s19 = scalar_select %p86_p0, %s2040_s13, %s88_s18  }
   0x7   : > { %p2123_p4 = por %p99_p2, %p98_p1  ;;  %p149_p5 = scmp.lt.s32.totalorder %s2044_s14, 3 }
   0x9   : > { %p150_p6 = pnand %p1431_p3, %p149_p5 }
   0xa   : > { %v232_v0 = vld [vmem:[%s3477_s1 + $0x8] sm:$0xff] (!%p150_p6)  ;;  %v234_v2 = vld [vmem:[%s3477_s1 + $0x18] sm:$0xff] (!%p150_p6)  ;;  %v231_v5 = vld [vmem:[%s3477_s1] sm:$0xff] (!%p150_p6)  ;;  %s2308_s9 = smul.u32 (!%p150_p6), 5, %s2111_s15  ;;  %s175_s17 = sand.u32 (!%p150_p6), 1, %s2036_s12  }
   0xb   : > { %153 = sbr.rel (%p150_p6) target bundleno = 502 (0x1f6), region = 32  ;;  %v236_v1 = vld [vmem:[%s3477_s1 + $0x28] sm:$0xff] (!%p150_p6)  ;;  %v238_v4 = vld [vmem:[%s3477_s1 + $0x38] sm:$0xff] (!%p150_p6)  ;;  %v235_v6 = vld [vmem:[%s3477_s1 + $0x20] sm:$0xff] (!%p150_p6) }
   0xc   : > { %v1451_v3 = vpack.c.bf16 (!%p150_p6), %v236_v1, %v232_v0  ;;  %v1643_v7 = vpack.c.bf16 (!%p150_p6), %v238_v4, %v234_v2  ;;  %v1453_v8 = vpack.c.bf16 (!%p150_p6), %v235_v6, %v231_v5  ;;  %v233_v9 = vld [vmem:[%s3477_s1 + $0x10] sm:$0xff] (!%p150_p6)  ;;  %v240_v11 = vld [vmem:[%s3477_s1 + $0x48] sm:$0xff] (!%p150_p6)  ;;  %v242_v14 = vld [vmem:[%s3477_s1 + $0x58] sm:$0xff] (!%p150_p6)  ;;  %p184_p7 = scmp.lt.s32.totalorder (!%p150_p6), %s2308_s9, 8  ;;  %s1895_s22 = smul.u32 (!%p150_p6), 160, %s175_s17 }
   0xd   : > { %v237_v10 = vld [vmem:[%s3477_s1 + $0x30] sm:$0xff] (!%p150_p6)  ;;  %v244_v13 = vld [vmem:[%s3477_s1 + $0x68] sm:$0xff] (!%p150_p6)  ;;  %v246_v15 = vld [vmem:[%s3477_s1 + $0x78] sm:$0xff] (!%p150_p6) }
   0xe   : > { %1452 = vmatprep.subr.bf16.mxu0 (!%p150_p6), %v1451_v3  ;;  %v1645_v12 = vpack.c.bf16 (!%p150_p6), %v237_v10, %v233_v9  ;;  %1644 = vmatprep.subr.bf16.mxu1 (!%p150_p6), %v1643_v7  ;;  %v1455_v16 = vpack.c.bf16 (!%p150_p6), %v244_v13, %v240_v11  ;;  %v1647_v17 = vpack.c.bf16 (!%p150_p6), %v246_v15, %v242_v14  ;;  %v239_v18 = vld [vmem:[%s3477_s1 + $0x40] sm:$0xff] (!%p150_p6)  ;;  %v241_v20 = vld [vmem:[%s3477_s1 + $0x50] sm:$0xff] (!%p150_p6)  ;;  %v248_v23 = vld [vmem:[%s3477_s1 + $0x88] sm:$0xff] (!%p150_p6)  ;;  %s3328_s12 = scalar_lea.vmem (!%p150_p6), [#allocation2], %s1895_s22  }
   0xf   : > { %1454 = vmatpush1.bf16.msra.mxu0 (!%p150_p6), %v1453_v8  ;;  %v243_v19 = vld [vmem:[%s3477_s1 + $0x60] sm:$0xff] (!%p150_p6)  ;;  %v245_v22 = vld [vmem:[%s3477_s1 + $0x70] sm:$0xff] (!%p150_p6)  ;;  %v252_v24 = vld [vmem:[%s3477_s1 + $0xa8] sm:$0xff] (!%p150_p6) }
  0x10   : > { %1646 = vmatpush1.bf16.msra.mxu1 (!%p150_p6), %v1645_v12  ;;  %v1457_v21 = vpack.c.bf16 (!%p150_p6), %v243_v19, %v239_v18  ;;  %1456 = vmatprep.subr.bf16.mxu0 (!%p150_p6), %v1455_v16  ;;  %v1649_v25 = vpack.c.bf16 (!%p150_p6), %v245_v22, %v241_v20  ;;  %v1459_v26 = vpack.c.bf16 (!%p150_p6), %v252_v24, %v248_v23  ;;  %v250_v27 = vld [vmem:[%s3477_s1 + $0x98] sm:$0xff] (!%p150_p6)  ;;  %v247_v29 = vld [vmem:[%s3477_s1 + $0x80] sm:$0xff] (!%p150_p6)  ;;  %v249_v32 = vld [vmem:[%s3477_s1 + $0x90] sm:$0xff] (!%p150_p6) }
  0x11   : > { %1648 = vmatprep.subr.bf16.mxu1 (!%p150_p6), %v1647_v17  ;;  %v254_v28 = vld [vmem:[%s3477_s1 + $0xb8] sm:$0xff] (!%p150_p6)  ;;  %v251_v31 = vld [vmem:[%s3477_s1 + $0xa0] sm:$0xff] (!%p150_p6)  ;;  %v253_v33 = vld [vmem:[%s3477_s1 + $0xb0] sm:$0xff] (!%p150_p6) }
  0x12   : > { %v1651_v30 = vpack.c.bf16 %v254_v28, %v250_v27  ;;  %v1461_v34 = vpack.c.bf16 %v251_v31, %v247_v29  ;;  %v256_v35 = vld [vmem:[%s3477_s1 + $0xc8] sm:$0xff]  ;;  %v258_v37 = vld [vmem:[%s3477_s1 + $0xd8] sm:$0xff]  ;;  %v1653_v38 = vpack.c.bf16 %v253_v33, %v249_v32  ;;  %v255_v41 = vld [vmem:[%s3477_s1 + $0xc0] sm:$0xff]  ;;  %s2362_s28 = scalar_select %p184_p7, %s2308_s9, 8 }
  0x13   : > { %1458 = vmatpush1.bf16.msra.mxu0 %v1457_v21  ;;  %v260_v36 = vld [vmem:[%s3477_s1 + $0xe8] sm:$0xff]  ;;  %v262_v40 = vld [vmem:[%s3477_s1 + $0xf8] sm:$0xff]  ;;  %v259_v42 = vld [vmem:[%s3477_s1 + $0xe0] sm:$0xff]  ;;  %s1450_s23 = smul.u32 (%p2123_p4), 160, %s2111_s15 }
  0x14   : > { %1650 = vmatpush1.bf16.msra.mxu1 %v1649_v25  ;;  %1460 = vmatprep.subr.bf16.mxu0 %v1459_v26  ;;  %v1463_v39 = vpack.c.bf16 %v260_v36, %v256_v35  ;;  %v1655_v43 = vpack.c.bf16 %v262_v40, %v258_v37  ;;  %v257_v44 = vld [vmem:[%s3477_s1 + $0xd0] sm:$0xff]  ;;  %v264_v46 = vld [vmem:[%s3477_s1 + $0x108] sm:$0xff]  ;;  %v266_v48 = vld [vmem:[%s3477_s1 + $0x118] sm:$0xff]  ;;  %v1465_v50 = vpack.c.bf16 %v259_v42, %v255_v41  ;;  %s1896_s25 = smul.u32 48, %s2362_s28 }
  0x15   : > { %1652 = vmatprep.subr.bf16.mxu1 %v1651_v30  ;;  %v261_v45 = vld [vmem:[%s3477_s1 + $0xf0] sm:$0xff]  ;;  %v268_v47 = vld [vmem:[%s3477_s1 + $0x128] sm:$0xff]  ;;  %v270_v49 = vld [vmem:[%s3477_s1 + $0x138] sm:$0xff]  ;;  %s3357_s29 = scalar_lea.vmem (%p2123_p4), %s3479_s3, %s1450_s23  }
  0x16   : > { %v1657_v51 = vpack.c.bf16 %v261_v45, %v257_v44  ;;  %v1467_v52 = vpack.c.bf16 %v268_v47, %v264_v46  ;;  %v263_v53 = vld [vmem:[%s3477_s1 + $0x100] sm:$0xff]  ;;  %v265_v55 = vld [vmem:[%s3477_s1 + $0x110] sm:$0xff]  ;;  %v1659_v56 = vpack.c.bf16 %v270_v49, %v266_v48  ;;  %v272_v58 = vld [vmem:[%s3477_s1 + $0x148] sm:$0xff]  ;;  %s2416_s24 = scalar_lea.vmem %s3476_s0, %s1896_s25 }
  0x17   : > { %1462 = vmatpush1.bf16.msra.mxu0 %v1461_v34  ;;  %v267_v54 = vld [vmem:[%s3477_s1 + $0x120] sm:$0xff]  ;;  %v269_v57 = vld [vmem:[%s3477_s1 + $0x130] sm:$0xff]  ;;  %v276_v59 = vld [vmem:[%s3477_s1 + $0x168] sm:$0xff] }
  0x18   : > { %1654 = vmatpush1.bf16.msra.mxu1 %v1653_v38  ;;  %1464 = vmatprep.subr.bf16.mxu0 %v1463_v39  ;;  %v274_v60 = vld [vmem:[%s3477_s1 + $0x158] sm:$0xff]  ;;  %v1469_v62 = vpack.c.bf16 %v267_v54, %v263_v53  ;;  %v1661_v63 = vpack.c.bf16 %v269_v57, %v265_v55  ;;  %v1471_v0 = vpack.c.bf16 %v276_v59, %v272_v58  ;;  %v271_v1 = vld [vmem:[%s3477_s1 + $0x140] sm:$0xff]  ;;  %v273_v3 = vld [vmem:[%s3477_s1 + $0x150] sm:$0xff] }
  0x19   : > { %1656 = vmatprep.subr.bf16.mxu1 %v1655_v43  ;;  %v278_v61 = vld [vmem:[%s3477_s1 + $0x178] sm:$0xff]  ;;  %v275_v2 = vld [vmem:[%s3477_s1 + $0x160] sm:$0xff]  ;;  %v277_v5 = vld [vmem:[%s3477_s1 + $0x170] sm:$0xff] }
  0x1a   : > { %v1663_v4 = vpack.c.bf16 %v278_v61, %v274_v60  ;;  %v280_v6 = vld [vmem:[%s3477_s1 + $0x188] sm:$0xff]  ;;  %v282_v8 = vld [vmem:[%s3477_s1 + $0x198] sm:$0xff]  ;;  %v1473_v10 = vpack.c.bf16 %v275_v2, %v271_v1  ;;  %v1665_v11 = vpack.c.bf16 %v277_v5, %v273_v3  ;;  %v279_v13 = vld [vmem:[%s3477_s1 + $0x180] sm:$0xff] }
  0x1b   : > { %1466 = vmatpush1.bf16.msra.mxu0 %v1465_v50  ;;  %v284_v7 = vld [vmem:[%s3477_s1 + $0x1a8] sm:$0xff]  ;;  %v286_v9 = vld [vmem:[%s3477_s1 + $0x1b8] sm:$0xff]  ;;  %v283_v14 = vld [vmem:[%s3477_s1 + $0x1a0] sm:$0xff] }
  0x1c   : > { %1658 = vmatpush1.bf16.msra.mxu1 %v1657_v51  ;;  %1468 = vmatprep.subr.bf16.mxu0 %v1467_v52  ;;  %v1475_v12 = vpack.c.bf16 %v284_v7, %v280_v6  ;;  %v281_v15 = vld [vmem:[%s3477_s1 + $0x190] sm:$0xff]  ;;  %v1667_v16 = vpack.c.bf16 %v286_v9, %v282_v8  ;;  %v288_v18 = vld [vmem:[%s3477_s1 + $0x1c8] sm:$0xff]  ;;  %v290_v20 = vld [vmem:[%s3477_s1 + $0x1d8] sm:$0xff]  ;;  %v1477_v22 = vpack.c.bf16 %v283_v14, %v279_v13 }
  0x1d   : > { %1660 = vmatprep.subr.bf16.mxu1 %v1659_v56  ;;  %v285_v17 = vld [vmem:[%s3477_s1 + $0x1b0] sm:$0xff]  ;;  %v292_v19 = vld [vmem:[%s3477_s1 + $0x1e8] sm:$0xff]  ;;  %v294_v21 = vld [vmem:[%s3477_s1 + $0x1f8] sm:$0xff] }
  0x1e   : > { %v1669_v23 = vpack.c.bf16 %v285_v17, %v281_v15  ;;  %v1479_v24 = vpack.c.bf16 %v292_v19, %v288_v18  ;;  %v287_v25 = vld [vmem:[%s3477_s1 + $0x1c0] sm:$0xff]  ;;  %v289_v27 = vld [vmem:[%s3477_s1 + $0x1d0] sm:$0xff]  ;;  %v1671_v28 = vpack.c.bf16 %v294_v21, %v290_v20  ;;  %v296_v30 = vld [vmem:[%s3477_s1 + $0x208] sm:$0xff] }
  0x1f   : > { %1470 = vmatpush1.bf16.msra.mxu0 %v1469_v62  ;;  %v291_v26 = vld [vmem:[%s3477_s1 + $0x1e0] sm:$0xff]  ;;  %v293_v29 = vld [vmem:[%s3477_s1 + $0x1f0] sm:$0xff]  ;;  %v300_v31 = vld [vmem:[%s3477_s1 + $0x228] sm:$0xff] }
  0x20   : > { %1662 = vmatpush1.bf16.msra.mxu1 %v1661_v63  ;;  %1472 = vmatprep.subr.bf16.mxu0 %v1471_v0  ;;  %v298_v32 = vld [vmem:[%s3477_s1 + $0x218] sm:$0xff]  ;;  %v1481_v34 = vpack.c.bf16 %v291_v26, %v287_v25  ;;  %v1673_v35 = vpack.c.bf16 %v293_v29, %v289_v27  ;;  %v1483_v36 = vpack.c.bf16 %v300_v31, %v296_v30  ;;  %v295_v37 = vld [vmem:[%s3477_s1 + $0x200] sm:$0xff]  ;;  %v297_v39 = vld [vmem:[%s3477_s1 + $0x210] sm:$0xff] }
  0x21   : > { %1664 = vmatprep.subr.bf16.mxu1 %v1663_v4  ;;  %v302_v33 = vld [vmem:[%s3477_s1 + $0x238] sm:$0xff]  ;;  %v299_v38 = vld [vmem:[%s3477_s1 + $0x220] sm:$0xff]  ;;  %v301_v41 = vld [vmem:[%s3477_s1 + $0x230] sm:$0xff] }
  0x22   : > { %v1675_v40 = vpack.c.bf16 %v302_v33, %v298_v32  ;;  %v304_v42 = vld [vmem:[%s3477_s1 + $0x248] sm:$0xff]  ;;  %v306_v44 = vld [vmem:[%s3477_s1 + $0x258] sm:$0xff]  ;;  %v1485_v46 = vpack.c.bf16 %v299_v38, %v295_v37  ;;  %v1677_v47 = vpack.c.bf16 %v301_v41, %v297_v39  ;;  %v303_v49 = vld [vmem:[%s3477_s1 + $0x240] sm:$0xff] }
  0x23   : > { %1474 = vmatpush1.bf16.msra.mxu0 %v1473_v10  ;;  %v308_v43 = vld [vmem:[%s3477_s1 + $0x268] sm:$0xff]  ;;  %v310_v45 = vld [vmem:[%s3477_s1 + $0x278] sm:$0xff]  ;;  %v307_v50 = vld [vmem:[%s3477_s1 + $0x260] sm:$0xff] }
  0x24   : > { %1666 = vmatpush1.bf16.msra.mxu1 %v1665_v11  ;;  %1476 = vmatprep.subr.bf16.mxu0 %v1475_v12  ;;  %v1487_v48 = vpack.c.bf16 %v308_v43, %v304_v42  ;;  %v305_v51 = vld [vmem:[%s3477_s1 + $0x250] sm:$0xff]  ;;  %v1679_v52 = vpack.c.bf16 %v310_v45, %v306_v44  ;;  %v312_v54 = vld [vmem:[%s3477_s1 + $0x288] sm:$0xff]  ;;  %v314_v56 = vld [vmem:[%s3477_s1 + $0x298] sm:$0xff]  ;;  %v1489_v58 = vpack.c.bf16 %v307_v50, %v303_v49 }
  0x25   : > { %1668 = vmatprep.subr.bf16.mxu1 %v1667_v16  ;;  %v309_v53 = vld [vmem:[%s3477_s1 + $0x270] sm:$0xff]  ;;  %v316_v55 = vld [vmem:[%s3477_s1 + $0x2a8] sm:$0xff]  ;;  %v318_v57 = vld [vmem:[%s3477_s1 + $0x2b8] sm:$0xff] }
  0x26   : > { %v1681_v59 = vpack.c.bf16 %v309_v53, %v305_v51  ;;  %v1491_v60 = vpack.c.bf16 %v316_v55, %v312_v54  ;;  %v311_v61 = vld [vmem:[%s3477_s1 + $0x280] sm:$0xff]  ;;  %v313_v63 = vld [vmem:[%s3477_s1 + $0x290] sm:$0xff]  ;;  %v1683_v0 = vpack.c.bf16 %v318_v57, %v314_v56  ;;  %v320_v2 = vld [vmem:[%s3477_s1 + $0x2c8] sm:$0xff] }
  0x27   : > { %1478 = vmatpush1.bf16.msra.mxu0 %v1477_v22  ;;  %v315_v62 = vld [vmem:[%s3477_s1 + $0x2a0] sm:$0xff]  ;;  %v317_v1 = vld [vmem:[%s3477_s1 + $0x2b0] sm:$0xff]  ;;  %v324_v3 = vld [vmem:[%s3477_s1 + $0x2e8] sm:$0xff] }
  0x28   : > { %1670 = vmatpush1.bf16.msra.mxu1 %v1669_v23  ;;  %1480 = vmatprep.subr.bf16.mxu0 %v1479_v24  ;;  %v322_v4 = vld [vmem:[%s3477_s1 + $0x2d8] sm:$0xff]  ;;  %v1493_v6 = vpack.c.bf16 %v315_v62, %v311_v61  ;;  %v319_v7 = vld [vmem:[%s3477_s1 + $0x2c0] sm:$0xff]  ;;  %v1685_v8 = vpack.c.bf16 %v317_v1, %v313_v63  ;;  %v1495_v9 = vpack.c.bf16 %v324_v3, %v320_v2  ;;  %v321_v11 = vld [vmem:[%s3477_s1 + $0x2d0] sm:$0xff] }
  0x29   : > { %1672 = vmatprep.subr.bf16.mxu1 %v1671_v28  ;;  %v326_v5 = vld [vmem:[%s3477_s1 + $0x2f8] sm:$0xff]  ;;  %v323_v10 = vld [vmem:[%s3477_s1 + $0x2e0] sm:$0xff]  ;;  %v325_v12 = vld [vmem:[%s3477_s1 + $0x2f0] sm:$0xff] }
  0x2a   : > { %v1687_v13 = vpack.c.bf16 %v326_v5, %v322_v4  ;;  %v328_v14 = vld [vmem:[%s3477_s1 + $0x308] sm:$0xff]  ;;  %v330_v17 = vld [vmem:[%s3477_s1 + $0x318] sm:$0xff]  ;;  %v1497_v19 = vpack.c.bf16 %v323_v10, %v319_v7  ;;  %v1689_v20 = vpack.c.bf16 %v325_v12, %v321_v11  ;;  %v327_v22 = vld [vmem:[%s3477_s1 + $0x300] sm:$0xff] }
  0x2b   : > { %1482 = vmatpush1.bf16.msra.mxu0 %v1481_v34  ;;  %v332_v15 = vld [vmem:[%s3477_s1 + $0x328] sm:$0xff]  ;;  %v334_v18 = vld [vmem:[%s3477_s1 + $0x338] sm:$0xff]  ;;  %v331_v23 = vld [vmem:[%s3477_s1 + $0x320] sm:$0xff] }
  0x2c   : > { %1674 = vmatpush1.bf16.msra.mxu1 %v1673_v35  ;;  %1484 = vmatprep.subr.bf16.mxu0 %v1483_v36  ;;  %v202_v16 = vld [vmem:[%s2416_s24 + $0x8] sm:$0xff]  ;;  %v1499_v21 = vpack.c.bf16 %v332_v15, %v328_v14  ;;  %v329_v24 = vld [vmem:[%s3477_s1 + $0x310] sm:$0xff]  ;;  %v1691_v25 = vpack.c.bf16 %v334_v18, %v330_v17  ;;  %v338_v29 = vld [vmem:[%s3477_s1 + $0x358] sm:$0xff]  ;;  %v1501_v31 = vpack.c.bf16 %v331_v23, %v327_v22 }
  0x2d   : > { %1676 = vmatprep.subr.bf16.mxu1 %v1675_v40  ;;  %701 = vmatprep.mubr.f32.mxu0 %v202_v16  ;;  %v333_v26 = vld [vmem:[%s3477_s1 + $0x330] sm:$0xff]  ;;  %v336_v27 = vld [vmem:[%s3477_s1 + $0x348] sm:$0xff]  ;;  %v342_v30 = vld [vmem:[%s3477_s1 + $0x378] sm:$0xff] }
  0x2e   : > { %986 = vmatprep.mubr.f32.mxu1 %v202_v16  ;;  %v340_v28 = vld [vmem:[%s3477_s1 + $0x368] sm:$0xff]  ;;  %v1693_v32 = vpack.c.bf16 %v333_v26, %v329_v24  ;;  %v335_v34 = vld [vmem:[%s3477_s1 + $0x340] sm:$0xff]  ;;  %v337_v36 = vld [vmem:[%s3477_s1 + $0x350] sm:$0xff]  ;;  %v1695_v37 = vpack.c.bf16 %v342_v30, %v338_v29 }
  0x2f   : > { %1486 = vmatpush1.bf16.msra.mxu0 %v1485_v46  ;;  %v1503_v33 = vpack.c.bf16 %v340_v28, %v336_v27  ;;  %v339_v35 = vld [vmem:[%s3477_s1 + $0x360] sm:$0xff]  ;;  %v341_v38 = vld [vmem:[%s3477_s1 + $0x370] sm:$0xff]  ;;  %v344_v39 = vld [vmem:[%s3477_s1 + $0x388] sm:$0xff] }
  0x30   : > { %1678 = vmatpush1.bf16.msra.mxu1 %v1677_v47  ;;  %1488 = vmatprep.subr.bf16.mxu0 %v1487_v48  ;;  %v348_v40 = vld [vmem:[%s3477_s1 + $0x3a8] sm:$0xff]  ;;  %v346_v41 = vld [vmem:[%s3477_s1 + $0x398] sm:$0xff]  ;;  %v1505_v43 = vpack.c.bf16 %v339_v35, %v335_v34  ;;  %v1697_v44 = vpack.c.bf16 %v341_v38, %v337_v36  ;;  %v343_v46 = vld [vmem:[%s3477_s1 + $0x380] sm:$0xff] }
  0x31   : > { %1680 = vmatprep.subr.bf16.mxu1 %v1679_v52  ;;  %v350_v42 = vld [vmem:[%s3477_s1 + $0x3b8] sm:$0xff]  ;;  %v1507_v45 = vpack.c.bf16 %v348_v40, %v344_v39  ;;  %v347_v47 = vld [vmem:[%s3477_s1 + $0x3a0] sm:$0xff]  ;;  %v345_v48 = vld [vmem:[%s3477_s1 + $0x390] sm:$0xff] }
  0x32   : > { %v1699_v49 = vpack.c.bf16 %v350_v42, %v346_v41  ;;  %v349_v50 = vld [vmem:[%s3477_s1 + $0x3b0] sm:$0xff]  ;;  %v352_v51 = vld [vmem:[%s3477_s1 + $0x3c8] sm:$0xff]  ;;  %v354_v53 = vld [vmem:[%s3477_s1 + $0x3d8] sm:$0xff]  ;;  %v1509_v55 = vpack.c.bf16 %v347_v47, %v343_v46 }
  0x33   : > { %1490 = vmatpush1.bf16.msra.mxu0 %v1489_v58  ;;  %v356_v52 = vld [vmem:[%s3477_s1 + $0x3e8] sm:$0xff]  ;;  %v358_v54 = vld [vmem:[%s3477_s1 + $0x3f8] sm:$0xff]  ;;  %v1701_v56 = vpack.c.bf16 %v349_v50, %v345_v48  ;;  %v351_v58 = vld [vmem:[%s3477_s1 + $0x3c0] sm:$0xff] }
  0x34   : > { %1682 = vmatpush1.bf16.msra.mxu1 %v1681_v59  ;;  %1492 = vmatprep.subr.bf16.mxu0 %v1491_v60  ;;  %v1511_v57 = vpack.c.bf16 %v356_v52, %v352_v51  ;;  %v355_v59 = vld [vmem:[%s3477_s1 + $0x3e0] sm:$0xff]  ;;  %v353_v60 = vld [vmem:[%s3477_s1 + $0x3d0] sm:$0xff]  ;;  %v1703_v61 = vpack.c.bf16 %v358_v54, %v354_v53  ;;  %v360_v63 = vld [vmem:[%s3477_s1 + $0x408] sm:$0xff] }
  0x35   : > { %1684 = vmatprep.subr.bf16.mxu1 %v1683_v0  ;;  %v357_v62 = vld [vmem:[%s3477_s1 + $0x3f0] sm:$0xff]  ;;  %v364_v0 = vld [vmem:[%s3477_s1 + $0x428] sm:$0xff]  ;;  %v362_v1 = vld [vmem:[%s3477_s1 + $0x418] sm:$0xff]  ;;  %v1513_v3 = vpack.c.bf16 %v355_v59, %v351_v58 }
  0x36   : > { %v366_v2 = vld [vmem:[%s3477_s1 + $0x438] sm:$0xff]  ;;  %v1705_v4 = vpack.c.bf16 %v357_v62, %v353_v60  ;;  %v1515_v5 = vpack.c.bf16 %v364_v0, %v360_v63  ;;  %v363_v7 = vld [vmem:[%s3477_s1 + $0x420] sm:$0xff]  ;;  %v365_v10 = vld [vmem:[%s3477_s1 + $0x430] sm:$0xff] }
  0x37   : > { %1494 = vmatpush1.bf16.msra.mxu0 %v1493_v6  ;;  %v359_v6 = vld [vmem:[%s3477_s1 + $0x400] sm:$0xff]  ;;  %v368_v11 = vld [vmem:[%s3477_s1 + $0x448] sm:$0xff]  ;;  %v374_v14 = vld [vmem:[%s3477_s1 + $0x478] sm:$0xff] }
  0x38   : > { %1686 = vmatpush1.bf16.msra.mxu1 %v1685_v8  ;;  %1496 = vmatprep.subr.bf16.mxu0 %v1495_v9  ;;  %v361_v8 = vld [vmem:[%s3477_s1 + $0x410] sm:$0xff]  ;;  %v1707_v9 = vpack.c.bf16 %v366_v2, %v362_v1  ;;  %v372_v12 = vld [vmem:[%s3477_s1 + $0x468] sm:$0xff]  ;;  %v201_v15 = vld [vmem:[%s2416_s24] sm:$0xff]  ;;  %v1517_v16 = vpack.c.bf16 %v363_v7, %v359_v6 }
  0x39   : > { %1688 = vmatprep.subr.bf16.mxu1 %v1687_v13  ;;  %v370_v13 = vld [vmem:[%s3477_s1 + $0x458] sm:$0xff]  ;;  %v1709_v17 = vpack.c.bf16 %v365_v10, %v361_v8  ;;  %v1519_v18 = vpack.c.bf16 %v372_v12, %v368_v11  ;;  %v373_v23 = vld [vmem:[%s3477_s1 + $0x470] sm:$0xff]  ;;  %v376_v24 = vld [vmem:[%s3477_s1 + $0x488] sm:$0xff] }
  0x3a   : > { %v1711_v22 = vpack.c.bf16 %v374_v14, %v370_v13  ;;  %v378_v26 = vld [vmem:[%s3477_s1 + $0x498] sm:$0xff]  ;;  %v381_v35 = vld [vmem:[%s3477_s1 + $0x4b0] sm:$0xff]  ;;  %v384_v36 = vld [vmem:[%s3477_s1 + $0x4c8] sm:$0xff] }
  0x3b   : > { %1498 = vmatpush1.bf16.msra.mxu0 %v1497_v19  ;;  %v367_v19 = vld [vmem:[%s3477_s1 + $0x440] sm:$0xff]  ;;  %v382_v27 = vld [vmem:[%s3477_s1 + $0x4b8] sm:$0xff]  ;;  %v389_v47 = vld [vmem:[%s3477_s1 + $0x4f0] sm:$0xff] }
  0x3c   : > { %1690 = vmatpush1.bf16.msra.mxu1 %v1689_v20  ;;  %1500 = vmatprep.subr.bf16.mxu0 %v1499_v21  ;;  %v371_v20 = vld [vmem:[%s3477_s1 + $0x460] sm:$0xff]  ;;  %v369_v21 = vld [vmem:[%s3477_s1 + $0x450] sm:$0xff]  ;;  %v1715_v34 = vpack.c.bf16 %v382_v27, %v378_v26  ;;  %v386_v38 = vld [vmem:[%s3477_s1 + $0x4d8] sm:$0xff] }
  0x3d   : > { %1692 = vmatprep.subr.bf16.mxu1 %v1691_v25  ;;  %v380_v25 = vld [vmem:[%s3477_s1 + $0x4a8] sm:$0xff]  ;;  %v1521_v28 = vpack.c.bf16 %v371_v20, %v367_v19  ;;  %v1713_v29 = vpack.c.bf16 %v373_v23, %v369_v21  ;;  %v390_v39 = vld [vmem:[%s3477_s1 + $0x4f8] sm:$0xff]  ;;  %v391_v54 = vld [vmem:[%s3477_s1 + $0x500] sm:$0xff] }
  0x3e   : > { %v1523_v30 = vpack.c.bf16 %v380_v25, %v376_v24  ;;  %v1719_v46 = vpack.c.bf16 %v390_v39, %v386_v38  ;;  %v392_v48 = vld [vmem:[%s3477_s1 + $0x508] sm:$0xff]  ;;  %v394_v50 = vld [vmem:[%s3477_s1 + $0x518] sm:$0xff]  ;;  %v393_v58 = vld [vmem:[%s3477_s1 + $0x510] sm:$0xff] }
  0x3f   : > { %1502 = vmatpush1.bf16.msra.mxu0 %v1501_v31  ;;  %v375_v31 = vld [vmem:[%s3477_s1 + $0x480] sm:$0xff]  ;;  %v398_v51 = vld [vmem:[%s3477_s1 + $0x538] sm:$0xff]  ;;  %v397_v59 = vld [vmem:[%s3477_s1 + $0x530] sm:$0xff] }
  0x40   : > { %1694 = vmatpush1.bf16.msra.mxu1 %v1693_v32  ;;  %1504 = vmatprep.subr.bf16.mxu0 %v1503_v33  ;;  %v379_v32 = vld [vmem:[%s3477_s1 + $0x4a0] sm:$0xff]  ;;  %v377_v33 = vld [vmem:[%s3477_s1 + $0x490] sm:$0xff]  ;;  %v208_v52 = vld [vmem:[%s2416_s24 + $0x38] sm:$0xff]  ;;  %v1725_v6 = vpack.c.bf16 %v397_v59, %v393_v58 }
  0x41   : > { %1696 = vmatprep.subr.bf16.mxu1 %v1695_v37  ;;  %v388_v37 = vld [vmem:[%s3477_s1 + $0x4e8] sm:$0xff]  ;;  %v1525_v40 = vpack.c.bf16 %v379_v32, %v375_v31  ;;  %v1717_v41 = vpack.c.bf16 %v381_v35, %v377_v33  ;;  %v207_v60 = vld [vmem:[%s2416_s24 + $0x30] sm:$0xff]  ;;  %v402_v1 = vld [vmem:[%s3477_s1 + $0x558] sm:$0xff] }
  0x42   : > { %v1527_v42 = vpack.c.bf16 %v388_v37, %v384_v36  ;;  %v400_v62 = vld [vmem:[%s3477_s1 + $0x548] sm:$0xff]  ;;  %v406_v2 = vld [vmem:[%s3477_s1 + $0x578] sm:$0xff]  ;;  %v403_v8 = vld [vmem:[%s3477_s1 + $0x560] sm:$0xff] }
  0x43   : > { %1506 = vmatpush1.bf16.msra.mxu0 %v1505_v43  ;;  %v383_v43 = vld [vmem:[%s3477_s1 + $0x4c0] sm:$0xff]  ;;  %v404_v63 = vld [vmem:[%s3477_s1 + $0x568] sm:$0xff]  ;;  %v405_v10 = vld [vmem:[%s3477_s1 + $0x570] sm:$0xff]  ;;  %v1727_v11 = vpack.c.bf16 %v406_v2, %v402_v1 }
  0x44   : > { %1698 = vmatpush1.bf16.msra.mxu1 %v1697_v44  ;;  %1508 = vmatprep.subr.bf16.mxu0 %v1507_v45  ;;  %v387_v44 = vld [vmem:[%s3477_s1 + $0x4e0] sm:$0xff]  ;;  %v385_v45 = vld [vmem:[%s3477_s1 + $0x4d0] sm:$0xff]  ;;  %v214_v0 = vld [vmem:[%s2416_s24 + $0x68] sm:$0xff]  ;;  %v1535_v7 = vpack.c.bf16 %v404_v63, %v400_v62 }
  0x45   : > { %1700 = vmatprep.subr.bf16.mxu1 %v1699_v49  ;;  %v396_v49 = vld [vmem:[%s3477_s1 + $0x528] sm:$0xff]  ;;  %v1529_v53 = vpack.c.bf16 %v387_v44, %v383_v43  ;;  %v220_v14 = vld [vmem:[%s2416_s24 + $0x98] sm:$0xff]  ;;  %v219_v19 = vld [vmem:[%s2416_s24 + $0x90] sm:$0xff] }
  0x46   : > { %v408_v12 = vld [vmem:[%s3477_s1 + $0x588] sm:$0xff]  ;;  %v409_v23 = vld [vmem:[%s3477_s1 + $0x590] sm:$0xff]  ;;  %v415_v32 = vld [vmem:[%s3477_s1 + $0x5c0] sm:$0xff] }
  0x47   : > { %1510 = vmatpush1.bf16.msra.mxu0 %v1509_v55  ;;  %v395_v55 = vld [vmem:[%s3477_s1 + $0x520] sm:$0xff]  ;;  %v412_v13 = vld [vmem:[%s3477_s1 + $0x5a8] sm:$0xff]  ;;  %v413_v26 = vld [vmem:[%s3477_s1 + $0x5b0] sm:$0xff] }
  0x48   : > { %1702 = vmatpush1.bf16.msra.mxu1 %v1701_v56  ;;  %1512 = vmatprep.subr.bf16.mxu0 %v1511_v57  ;;  %v1721_v56 = vpack.c.bf16 %v389_v47, %v385_v45  ;;  %v1531_v57 = vpack.c.bf16 %v396_v49, %v392_v48  ;;  %v1539_v21 = vpack.c.bf16 %v412_v13, %v408_v12  ;;  %v226_v24 = vld [vmem:[%s2416_s24 + $0xc8] sm:$0xff]  ;;  %v225_v33 = vld [vmem:[%s2416_s24 + $0xc0] sm:$0xff]  ;;  %v417_v37 = vld [vmem:[%s3477_s1 + $0x5d0] sm:$0xff] }
  0x49   : > { %1704 = vmatprep.subr.bf16.mxu1 %v1703_v61  ;;  %v1723_v61 = vpack.c.bf16 %v398_v51, %v394_v50  ;;  %v416_v27 = vld [vmem:[%s3477_s1 + $0x5c8] sm:$0xff]  ;;  %v419_v36 = vld [vmem:[%s3477_s1 + $0x5e0] sm:$0xff]  ;;  %v204_v38 = vld [vmem:[%s2416_s24 + $0x18] sm:$0xff] }
  0x4a   : > { %v426_v43 = vld [vmem:[%s3477_s1 + $0x618] sm:$0xff]  ;;  %v1545_v45 = vpack.c.bf16 %v419_v36, %v415_v32  ;;  %v423_v48 = vld [vmem:[%s3477_s1 + $0x600] sm:$0xff]  ;;  %v425_v50 = vld [vmem:[%s3477_s1 + $0x610] sm:$0xff] }
  0x4b   : > { %1514 = vmatpush1.bf16.msra.mxu0 %v1513_v3  ;;  %v1533_v3 = vpack.c.bf16 %v395_v55, %v391_v54  ;;  %v430_v44 = vld [vmem:[%s3477_s1 + $0x638] sm:$0xff]  ;;  %v427_v49 = vld [vmem:[%s3477_s1 + $0x620] sm:$0xff]  ;;  %v436_v54 = vld [vmem:[%s3477_s1 + $0x668] sm:$0xff] }
  0x4c   : > { %1706 = vmatpush1.bf16.msra.mxu1 %v1705_v4  ;;  %1516 = vmatprep.subr.bf16.mxu0 %v1515_v5  ;;  %v399_v4 = vld [vmem:[%s3477_s1 + $0x540] sm:$0xff]  ;;  %v1739_v51 = vpack.c.bf16 %v430_v44, %v426_v43  ;;  %v434_v55 = vld [vmem:[%s3477_s1 + $0x658] sm:$0xff]  ;;  %v433_v62 = vld [vmem:[%s3477_s1 + $0x650] sm:$0xff] }
  0x4d   : > { %1708 = vmatprep.subr.bf16.mxu1 %v1707_v9  ;;  %v213_v5 = vld [vmem:[%s2416_s24 + $0x60] sm:$0xff]  ;;  %v401_v9 = vld [vmem:[%s3477_s1 + $0x550] sm:$0xff]  ;;  %v440_v1 = vld [vmem:[%s3477_s1 + $0x688] sm:$0xff] }
  0x4e   : > { %702 = vmatmul.mubr.f32.vlgmr.msra.gmra.mrb[0].mxu0 %v201_v15  ;;  %v1729_v20 = vpack.c.bf16 %v405_v10, %v401_v9  ;;  %v444_v2 = vld [vmem:[%s3477_s1 + $0x6a8] sm:$0xff]  ;;  %v443_v9 = vld [vmem:[%s3477_s1 + $0x6a0] sm:$0xff]  ;;  %v441_v10 = vld [vmem:[%s3477_s1 + $0x690] sm:$0xff] }
  0x4f   : > { %1518 = vmatpush1.bf16.msra.mxu0 %v1517_v16  ;;  %987 = vmatmul.mubr.f32.vlgmr.msra.gmra.mrb[0].mxu1 %v201_v15  ;;  %v410_v15 = vld [vmem:[%s3477_s1 + $0x598] sm:$0xff]  ;;  %v445_v12 = vld [vmem:[%s3477_s1 + $0x6b0] sm:$0xff]  ;;  %v448_v13 = vld [vmem:[%s3477_s1 + $0x6c8] sm:$0xff] }
  0x50   : > { %1710 = vmatpush1.bf16.msra.mxu1 %v1709_v17  ;;  %1520 = vmatprep.subr.bf16.mxu0 %v1519_v18  ;;  %v414_v16 = vld [vmem:[%s3477_s1 + $0x5b8] sm:$0xff]  ;;  %v1537_v17 = vpack.c.bf16 %v403_v8, %v399_v4  ;;  %v407_v18 = vld [vmem:[%s3477_s1 + $0x580] sm:$0xff]  ;;  %v461_v36 = vld [vmem:[%s3477_s1 + $0x730] sm:$0xff] }
  0x51   : > { %1712 = vmatprep.subr.bf16.mxu1 %v1711_v22  ;;  %707 = vmatprep.mubr.f32.mxu0 %v208_v52  ;;  %v411_v22 = vld [vmem:[%s3477_s1 + $0x5a0] sm:$0xff]  ;;  %v1731_v25 = vpack.c.bf16 %v414_v16, %v410_v15  ;;  %v446_v4 = vld [vmem:[%s3477_s1 + $0x6b8] sm:$0xff] }
  0x52   : > { %992 = vmatprep.mubr.f32.mxu1 %v208_v52  ;;  %708 = vmatmul.mubr.f32.gmra.mrb[2].mxu0 %v207_v60  ;;  %v1541_v31 = vpack.c.bf16 %v411_v22, %v407_v18  ;;  %v429_v52 = vld [vmem:[%s3477_s1 + $0x630] sm:$0xff]  ;;  %v439_v8 = vld [vmem:[%s3477_s1 + $0x680] sm:$0xff]  ;;  %v450_v15 = vld [vmem:[%s3477_s1 + $0x6d8] sm:$0xff]  ;;  %v1749_v18 = vpack.c.bf16 %v445_v12, %v441_v10 }
  0x53   : > { %1522 = vmatpush1.bf16.msra.mxu0 %v1521_v28  ;;  %993 = vmatmul.mubr.f32.gmra.mrb[2].mxu1 %v207_v60  ;;  %v420_v28 = vld [vmem:[%s3477_s1 + $0x5e8] sm:$0xff]  ;;  %v1741_v58 = vpack.c.bf16 %v429_v52, %v425_v50  ;;  %v431_v60 = vld [vmem:[%s3477_s1 + $0x640] sm:$0xff]  ;;  %v454_v16 = vld [vmem:[%s3477_s1 + $0x6f8] sm:$0xff] }
  0x54   : > { %1714 = vmatpush1.bf16.msra.mxu1 %v1713_v29  ;;  %1524 = vmatprep.subr.bf16.mxu0 %v1523_v30  ;;  %v418_v29 = vld [vmem:[%s3477_s1 + $0x5d8] sm:$0xff]  ;;  %v1543_v35 = vpack.c.bf16 %v420_v28, %v416_v27  ;;  %v449_v22 = vld [vmem:[%s3477_s1 + $0x6d0] sm:$0xff]  ;;  %v455_v32 = vld [vmem:[%s3477_s1 + $0x700] sm:$0xff] }
  0x55   : > { %1716 = vmatprep.subr.bf16.mxu1 %v1715_v34  ;;  %713 = vmatprep.mubr.f32.mxu0 %v214_v0  ;;  %v422_v30 = vld [vmem:[%s3477_s1 + $0x5f8] sm:$0xff]  ;;  %v1733_v34 = vpack.c.bf16 %v413_v26, %v409_v23  ;;  %v1751_v23 = vpack.c.bf16 %v454_v16, %v450_v15  ;;  %v460_v26 = vld [vmem:[%s3477_s1 + $0x728] sm:$0xff]  ;;  %v463_v44 = vld [vmem:[%s3477_s1 + $0x740] sm:$0xff] }
  0x56   : > { %998 = vmatprep.mubr.f32.mxu1 %v214_v0  ;;  %714 = vmatmul.mubr.f32.gmra.mrb[4].mxu0 %v213_v5  ;;  %v1735_v39 = vpack.c.bf16 %v422_v30, %v418_v29  ;;  %v437_v0 = vld [vmem:[%s3477_s1 + $0x670] sm:$0xff]  ;;  %v458_v27 = vld [vmem:[%s3477_s1 + $0x718] sm:$0xff]  ;;  %v476_v50 = vld [vmem:[%s3477_s1 + $0x7a8] sm:$0xff] }
  0x57   : > { %1526 = vmatpush1.bf16.msra.mxu0 %v1525_v40  ;;  %999 = vmatmul.mubr.f32.gmra.mrb[4].mxu1 %v213_v5  ;;  %v421_v40 = vld [vmem:[%s3477_s1 + $0x5f0] sm:$0xff]  ;;  %v462_v28 = vld [vmem:[%s3477_s1 + $0x738] sm:$0xff]  ;;  %v492_v10 = vld [vmem:[%s3477_s1 + $0x828] sm:$0xff] }
  0x58   : > { %1718 = vmatpush1.bf16.msra.mxu1 %v1717_v41  ;;  %1528 = vmatprep.subr.bf16.mxu0 %v1527_v42  ;;  %v424_v41 = vld [vmem:[%s3477_s1 + $0x608] sm:$0xff]  ;;  %v478_v52 = vld [vmem:[%s3477_s1 + $0x7b8] sm:$0xff]  ;;  %v487_v16 = vld [vmem:[%s3477_s1 + $0x800] sm:$0xff] }
  0x59   : > { %1720 = vmatprep.subr.bf16.mxu1 %v1719_v46  ;;  %719 = vmatprep.mubr.f32.mxu0 %v220_v14  ;;  %v428_v42 = vld [vmem:[%s3477_s1 + $0x628] sm:$0xff]  ;;  %v1737_v46 = vpack.c.bf16 %v421_v40, %v417_v37  ;;  %v470_v40 = vld [vmem:[%s3477_s1 + $0x778] sm:$0xff] }
  0x5a   : > { %1004 = vmatprep.mubr.f32.mxu1 %v220_v14  ;;  %720 = vmatmul.mubr.f32.gmra.mrb[6].mxu0 %v219_v19  ;;  %v1547_v47 = vpack.c.bf16 %v428_v42, %v424_v41  ;;  %v452_v14 = vld [vmem:[%s3477_s1 + $0x6e8] sm:$0xff]  ;;  %v494_v12 = vld [vmem:[%s3477_s1 + $0x838] sm:$0xff] }
  0x5b   : > { %1530 = vmatpush1.bf16.msra.mxu0 %v1529_v53  ;;  %1005 = vmatmul.mubr.f32.gmra.mrb[6].mxu1 %v219_v19  ;;  %v432_v53 = vld [vmem:[%s3477_s1 + $0x648] sm:$0xff]  ;;  %v1559_v19 = vpack.c.bf16 %v452_v14, %v448_v13 }
  0x5c   : > { %1722 = vmatpush1.bf16.msra.mxu1 %v1721_v56  ;;  %1532 = vmatprep.subr.bf16.mxu0 %v1531_v57  ;;  %v438_v56 = vld [vmem:[%s3477_s1 + $0x678] sm:$0xff]  ;;  %v1549_v57 = vpack.c.bf16 %v427_v49, %v423_v48  ;;  %v1551_v59 = vpack.c.bf16 %v436_v54, %v432_v53  ;;  %v464_v37 = vld [vmem:[%s3477_s1 + $0x748] sm:$0xff]  ;;  %v469_v48 = vld [vmem:[%s3477_s1 + $0x770] sm:$0xff] }
  0x5d   : > { %1724 = vmatprep.subr.bf16.mxu1 %v1723_v61  ;;  %725 = vmatprep.mubr.f32.mxu0 %v226_v24  ;;  %v435_v61 = vld [vmem:[%s3477_s1 + $0x660] sm:$0xff]  ;;  %v1743_v63 = vpack.c.bf16 %v438_v56, %v434_v55  ;;  %v472_v49 = vld [vmem:[%s3477_s1 + $0x788] sm:$0xff] }
  0x5e   : > { %1010 = vmatprep.mubr.f32.mxu1 %v226_v24  ;;  %726 = vmatmul.mubr.f32.gmra.mrb[8].mxu0 %v225_v33  ;;  %v1553_v5 = vpack.c.bf16 %v435_v61, %v431_v60  ;;  %v453_v24 = vld [vmem:[%s3477_s1 + $0x6f0] sm:$0xff]  ;;  %v1571_v55 = vpack.c.bf16 %v476_v50, %v472_v49  ;;  %v471_v56 = vld [vmem:[%s3477_s1 + $0x780] sm:$0xff]  ;;  %v480_v61 = vld [vmem:[%s3477_s1 + $0x7c8] sm:$0xff] }
  0x5f   : > { %1534 = vmatpush1.bf16.msra.mxu0 %v1533_v3  ;;  %1011 = vmatmul.mubr.f32.gmra.mrb[8].mxu1 %v225_v33  ;;  %v442_v3 = vld [vmem:[%s3477_s1 + $0x698] sm:$0xff]  ;;  %v1753_v30 = vpack.c.bf16 %v453_v24, %v449_v22  ;;  %v459_v33 = vld [vmem:[%s3477_s1 + $0x720] sm:$0xff]  ;;  %v477_v60 = vld [vmem:[%s3477_s1 + $0x7b0] sm:$0xff] }
  0x60   : > { %1726 = vmatpush1.bf16.msra.mxu1 %v1725_v6  ;;  %1536 = vmatprep.subr.bf16.mxu0 %v1535_v7  ;;  %v1745_v6 = vpack.c.bf16 %v437_v0, %v433_v62  ;;  %v1555_v7 = vpack.c.bf16 %v444_v2, %v440_v1  ;;  %v1565_v41 = vpack.c.bf16 %v459_v33, %v455_v32  ;;  %v484_v62 = vld [vmem:[%s3477_s1 + $0x7e8] sm:$0xff]  ;;  %v486_v0 = vld [vmem:[%s3477_s1 + $0x7f8] sm:$0xff]  ;;  %v501_v33 = vld [vmem:[%s3477_s1 + $0x870] sm:$0xff] }
  0x61   : > { %1728 = vmatprep.subr.bf16.mxu1 %v1727_v11  ;;  %796 = vmatprep.mubr.f32.mxu0 %v204_v38  ;;  %v1747_v11 = vpack.c.bf16 %v446_v4, %v442_v3  ;;  %v1575_v3 = vpack.c.bf16 %v484_v62, %v480_v61  ;;  %v479_v4 = vld [vmem:[%s3477_s1 + $0x7c0] sm:$0xff]  ;;  %v500_v22 = vld [vmem:[%s3477_s1 + $0x868] sm:$0xff]  ;;  %v502_v24 = vld [vmem:[%s3477_s1 + $0x878] sm:$0xff] }
  0x62   : > { %1081 = vmatprep.mubr.f32.mxu1 %v204_v38  ;;  %v468_v38 = vld [vmem:[%s3477_s1 + $0x768] sm:$0xff]  ;;  %v514_v50 = vld [vmem:[%s3477_s1 + $0x8d8] sm:$0xff]  ;;  %v517_v61 = vld [vmem:[%s3477_s1 + $0x8f0] sm:$0xff] }
  0x63   : > { %1538 = vmatpush1.bf16.msra.mxu0 %v1537_v17  ;;  %v1557_v17 = vpack.c.bf16 %v443_v9, %v439_v8  ;;  %v1567_v43 = vpack.c.bf16 %v468_v38, %v464_v37  ;;  %v485_v8 = vld [vmem:[%s3477_s1 + $0x7f0] sm:$0xff]  ;;  %v488_v9 = vld [vmem:[%s3477_s1 + $0x808] sm:$0xff]  ;;  %v510_v37 = vld [vmem:[%s3477_s1 + $0x8b8] sm:$0xff] }
  0x64   : > { %1730 = vmatpush1.bf16.msra.mxu1 %v1729_v20  ;;  %1540 = vmatprep.subr.bf16.mxu0 %v1539_v21  ;;  %v447_v20 = vld [vmem:[%s3477_s1 + $0x6c0] sm:$0xff]  ;;  %v1579_v15 = vpack.c.bf16 %v492_v10, %v488_v9  ;;  %v210_v38 = vld [vmem:[%s2416_s24 + $0x48] sm:$0xff]  ;;  %v521_v9 = vld [vmem:[%s3477_s1 + $0x910] sm:$0xff] }
  0x65   : > { %1732 = vmatprep.subr.bf16.mxu1 %v1731_v25  ;;  %v451_v21 = vld [vmem:[%s3477_s1 + $0x6e0] sm:$0xff]  ;;  %v456_v25 = vld [vmem:[%s3477_s1 + $0x708] sm:$0xff] }
  0x66   : > { %v1561_v29 = vpack.c.bf16 %v451_v21, %v447_v20  ;;  %v493_v20 = vld [vmem:[%s3477_s1 + $0x830] sm:$0xff]  ;;  %v496_v21 = vld [vmem:[%s3477_s1 + $0x848] sm:$0xff] }
  0x67   : > { %1542 = vmatpush1.bf16.msra.mxu0 %v1541_v31  ;;  %v1563_v31 = vpack.c.bf16 %v460_v26, %v456_v25  ;;  %v203_v25 = vld [vmem:[%s2416_s24 + $0x10] sm:$0xff]  ;;  %v516_v49 = vld [vmem:[%s3477_s1 + $0x8e8] sm:$0xff] }
  0x68   : > { %1734 = vmatpush1.bf16.msra.mxu1 %v1733_v34  ;;  %1544 = vmatprep.subr.bf16.mxu0 %v1543_v35  ;;  %v457_v34 = vld [vmem:[%s3477_s1 + $0x710] sm:$0xff]  ;;  %v1755_v35 = vpack.c.bf16 %v462_v28, %v458_v27  ;;  %v1583_v28 = vpack.c.bf16 %v500_v22, %v496_v21  ;;  %v520_v62 = vld [vmem:[%s3477_s1 + $0x908] sm:$0xff]  ;;  %v527_v21 = vld [vmem:[%s3477_s1 + $0x940] sm:$0xff] }
  0x69   : > { %1736 = vmatprep.subr.bf16.mxu1 %v1735_v39  ;;  %v466_v39 = vld [vmem:[%s3477_s1 + $0x758] sm:$0xff]  ;;  %v1757_v42 = vpack.c.bf16 %v461_v36, %v457_v34  ;;  %v504_v34 = vld [vmem:[%s3477_s1 + $0x888] sm:$0xff]  ;;  %v531_v22 = vld [vmem:[%s3477_s1 + $0x960] sm:$0xff] }
  0x6a   : > { %v506_v36 = vld [vmem:[%s3477_s1 + $0x898] sm:$0xff] }
  0x6b   : > { %1546 = vmatpush1.bf16.msra.mxu0 %v1545_v45  ;;  %v467_v45 = vld [vmem:[%s3477_s1 + $0x760] sm:$0xff] }
  0x6c   : > { %1738 = vmatpush1.bf16.msra.mxu1 %v1737_v46  ;;  %1548 = vmatprep.subr.bf16.mxu0 %v1547_v47  ;;  %v465_v46 = vld [vmem:[%s3477_s1 + $0x750] sm:$0xff]  ;;  %v1759_v47 = vpack.c.bf16 %v470_v40, %v466_v39  ;;  %v1569_v53 = vpack.c.bf16 %v467_v45, %v463_v44  ;;  %v209_v40 = vld [vmem:[%s2416_s24 + $0x40] sm:$0xff] }
  0x6d   : > { %1740 = vmatprep.subr.bf16.mxu1 %v1739_v51  ;;  %v474_v51 = vld [vmem:[%s3477_s1 + $0x798] sm:$0xff]  ;;  %v1761_v54 = vpack.c.bf16 %v469_v48, %v465_v46  ;;  %v507_v44 = vld [vmem:[%s3477_s1 + $0x8a0] sm:$0xff]  ;;  %v505_v45 = vld [vmem:[%s3477_s1 + $0x890] sm:$0xff]  ;;  %v1779_v46 = vpack.c.bf16 %v510_v37, %v506_v36 }
  0x6e   : > { %v512_v48 = vld [vmem:[%s3477_s1 + $0x8c8] sm:$0xff]  ;;  %v537_v36 = vld [vmem:[%s3477_s1 + $0x990] sm:$0xff] }
  0x6f   : > { %1550 = vmatpush1.bf16.msra.mxu0 %v1549_v57  ;;  %v475_v57 = vld [vmem:[%s3477_s1 + $0x7a0] sm:$0xff] }
  0x70   : > { %1742 = vmatpush1.bf16.msra.mxu1 %v1741_v58  ;;  %1552 = vmatprep.subr.bf16.mxu0 %v1551_v59  ;;  %v473_v58 = vld [vmem:[%s3477_s1 + $0x790] sm:$0xff]  ;;  %v1763_v59 = vpack.c.bf16 %v478_v52, %v474_v51  ;;  %v1573_v1 = vpack.c.bf16 %v475_v57, %v471_v56  ;;  %v518_v51 = vld [vmem:[%s3477_s1 + $0x8f8] sm:$0xff]  ;;  %v1591_v56 = vpack.c.bf16 %v516_v49, %v512_v48  ;;  %v511_v57 = vld [vmem:[%s3477_s1 + $0x8c0] sm:$0xff] }
  0x71   : > { %1744 = vmatprep.subr.bf16.mxu1 %v1743_v63  ;;  %v482_v63 = vld [vmem:[%s3477_s1 + $0x7d8] sm:$0xff]  ;;  %v1765_v2 = vpack.c.bf16 %v477_v60, %v473_v58  ;;  %v515_v58 = vld [vmem:[%s3477_s1 + $0x8e0] sm:$0xff]  ;;  %v1783_v60 = vpack.c.bf16 %v518_v51, %v514_v50  ;;  %v545_v48 = vld [vmem:[%s3477_s1 + $0x9d0] sm:$0xff] }
  0x72   : > { %v216_v52 = vld [vmem:[%s2416_s24 + $0x78] sm:$0xff]  ;;  %v549_v50 = vld [vmem:[%s3477_s1 + $0x9f0] sm:$0xff]  ;;  %v552_v51 = vld [vmem:[%s3477_s1 + $0xa08] sm:$0xff] }
  0x73   : > { %1554 = vmatpush1.bf16.msra.mxu0 %v1553_v5  ;;  %v483_v5 = vld [vmem:[%s3477_s1 + $0x7e0] sm:$0xff] }
  0x74   : > { %1746 = vmatpush1.bf16.msra.mxu1 %v1745_v6  ;;  %1556 = vmatprep.subr.bf16.mxu0 %v1555_v7  ;;  %v481_v6 = vld [vmem:[%s3477_s1 + $0x7d0] sm:$0xff]  ;;  %v1767_v7 = vpack.c.bf16 %v486_v0, %v482_v63  ;;  %v1577_v13 = vpack.c.bf16 %v483_v5, %v479_v4  ;;  %v524_v63 = vld [vmem:[%s3477_s1 + $0x928] sm:$0xff]  ;;  %v522_v0 = vld [vmem:[%s3477_s1 + $0x918] sm:$0xff] }
  0x75   : > { %1748 = vmatprep.subr.bf16.mxu1 %v1747_v11  ;;  %v490_v11 = vld [vmem:[%s3477_s1 + $0x818] sm:$0xff]  ;;  %v1769_v14 = vpack.c.bf16 %v485_v8, %v481_v6  ;;  %v221_v4 = vld [vmem:[%s2416_s24 + $0xa0] sm:$0xff]  ;;  %v1595_v6 = vpack.c.bf16 %v524_v63, %v520_v62  ;;  %v557_v62 = vld [vmem:[%s3477_s1 + $0xa30] sm:$0xff] }
  0x76   : > { %v523_v8 = vld [vmem:[%s3477_s1 + $0x920] sm:$0xff]  ;;  %v560_v63 = vld [vmem:[%s3477_s1 + $0xa48] sm:$0xff] }
  0x77   : > { %1558 = vmatpush1.bf16.msra.mxu0 %v1557_v17  ;;  %v491_v17 = vld [vmem:[%s3477_s1 + $0x820] sm:$0xff] }
  0x78   : > { %1750 = vmatpush1.bf16.msra.mxu1 %v1749_v18  ;;  %1560 = vmatprep.subr.bf16.mxu0 %v1559_v19  ;;  %v489_v18 = vld [vmem:[%s3477_s1 + $0x810] sm:$0xff]  ;;  %v1771_v19 = vpack.c.bf16 %v494_v12, %v490_v11  ;;  %v1581_v26 = vpack.c.bf16 %v491_v17, %v487_v16  ;;  %v528_v12 = vld [vmem:[%s3477_s1 + $0x948] sm:$0xff]  ;;  %v228_v16 = vld [vmem:[%s2416_s24 + $0xd8] sm:$0xff] }
  0x79   : > { %1752 = vmatprep.subr.bf16.mxu1 %v1751_v23  ;;  %v498_v23 = vld [vmem:[%s3477_s1 + $0x858] sm:$0xff]  ;;  %v1773_v27 = vpack.c.bf16 %v493_v20, %v489_v18  ;;  %v525_v11 = vld [vmem:[%s3477_s1 + $0x930] sm:$0xff] }
  0x7a   : > { %v1775_v32 = vpack.c.bf16 %v502_v24, %v498_v23  ;;  %v227_v18 = vld [vmem:[%s2416_s24 + $0xd0] sm:$0xff] }
  0x7b   : > { %1562 = vmatpush1.bf16.msra.mxu0 %v1561_v29  ;;  %v495_v29 = vld [vmem:[%s3477_s1 + $0x840] sm:$0xff]  ;;  %v529_v23 = vld [vmem:[%s3477_s1 + $0x950] sm:$0xff] }
  0x7c   : > { %1754 = vmatpush1.bf16.msra.mxu1 %v1753_v30  ;;  %1564 = vmatprep.subr.bf16.mxu0 %v1563_v31  ;;  %v499_v30 = vld [vmem:[%s3477_s1 + $0x860] sm:$0xff]  ;;  %v497_v31 = vld [vmem:[%s3477_s1 + $0x850] sm:$0xff] }
  0x7d   : > { %1756 = vmatprep.subr.bf16.mxu1 %v1755_v35  ;;  %v508_v35 = vld [vmem:[%s3477_s1 + $0x8a8] sm:$0xff]  ;;  %v1585_v39 = vpack.c.bf16 %v499_v30, %v495_v29  ;;  %v542_v29 = vld [vmem:[%s3477_s1 + $0x9b8] sm:$0xff] }
  0x7e   : > { %v206_v30 = vld [vmem:[%s2416_s24 + $0x28] sm:$0xff] }
  0x7f   : > { %1566 = vmatpush1.bf16.msra.mxu0 %v1565_v41  ;;  %v1777_v41 = vpack.c.bf16 %v501_v33, %v497_v31  ;;  %v1601_v31 = vpack.c.bf16 %v531_v22, %v527_v21  ;;  %v573_v22 = vld [vmem:[%s3477_s1 + $0xab0] sm:$0xff] }
  0x80   : > { %1758 = vmatpush1.bf16.msra.mxu1 %v1757_v42  ;;  %1568 = vmatprep.subr.bf16.mxu0 %v1567_v43  ;;  %v1587_v42 = vpack.c.bf16 %v508_v35, %v504_v34  ;;  %v503_v43 = vld [vmem:[%s3477_s1 + $0x880] sm:$0xff] }
  0x81   : > { %1760 = vmatprep.subr.bf16.mxu1 %v1759_v47  ;;  %v509_v47 = vld [vmem:[%s3477_s1 + $0x8b0] sm:$0xff]  ;;  %v535_v34 = vld [vmem:[%s3477_s1 + $0x980] sm:$0xff] }
  0x82   : > { %v539_v35 = vld [vmem:[%s3477_s1 + $0x9a0] sm:$0xff] }
  0x83   : > { %1570 = vmatpush1.bf16.msra.mxu0 %v1569_v53  ;;  %v1589_v53 = vpack.c.bf16 %v507_v44, %v503_v43  ;;  %v1605_v43 = vpack.c.bf16 %v539_v35, %v535_v34  ;;  %v581_v34 = vld [vmem:[%s3477_s1 + $0xaf0] sm:$0xff]  ;;  %v584_v35 = vld [vmem:[%s3477_s1 + $0xb08] sm:$0xff] }
  0x84   : > { %1762 = vmatpush1.bf16.msra.mxu1 %v1761_v54  ;;  %1572 = vmatprep.subr.bf16.mxu0 %v1571_v55  ;;  %v215_v54 = vld [vmem:[%s2416_s24 + $0x70] sm:$0xff]  ;;  %v1781_v55 = vpack.c.bf16 %v509_v47, %v505_v45  ;;  %v547_v47 = vld [vmem:[%s3477_s1 + $0x9e0] sm:$0xff] }
  0x85   : > { %1764 = vmatprep.subr.bf16.mxu1 %v1763_v59  ;;  %v513_v59 = vld [vmem:[%s3477_s1 + $0x8d0] sm:$0xff] }
  0x86   : > { %v1785_v5 = vpack.c.bf16 %v517_v61, %v513_v59  ;;  %v555_v59 = vld [vmem:[%s3477_s1 + $0xa20] sm:$0xff] }
  0x87   : > { %1574 = vmatpush1.bf16.msra.mxu0 %v1573_v1  ;;  %v526_v1 = vld [vmem:[%s3477_s1 + $0x938] sm:$0xff] }
  0x88   : > { %1766 = vmatpush1.bf16.msra.mxu1 %v1765_v2  ;;  %1576 = vmatprep.subr.bf16.mxu0 %v1575_v3  ;;  %v222_v2 = vld [vmem:[%s2416_s24 + $0xa8] sm:$0xff]  ;;  %v1593_v3 = vpack.c.bf16 %v515_v58, %v511_v57  ;;  %v1787_v10 = vpack.c.bf16 %v526_v1, %v522_v0  ;;  %v551_v58 = vld [vmem:[%s3477_s1 + $0xa00] sm:$0xff]  ;;  %v562_v1 = vld [vmem:[%s3477_s1 + $0xa58] sm:$0xff] }
  0x89   : > { %1768 = vmatprep.subr.bf16.mxu1 %v1767_v7  ;;  %v519_v7 = vld [vmem:[%s3477_s1 + $0x900] sm:$0xff]  ;;  %v564_v0 = vld [vmem:[%s3477_s1 + $0xa68] sm:$0xff] }
  0x8a   : > { %v1597_v17 = vpack.c.bf16 %v523_v8, %v519_v7  ;;  %v563_v7 = vld [vmem:[%s3477_s1 + $0xa60] sm:$0xff]  ;;  %v561_v8 = vld [vmem:[%s3477_s1 + $0xa50] sm:$0xff] }
  0x8b   : > { %1578 = vmatpush1.bf16.msra.mxu0 %v1577_v13  ;;  %v532_v13 = vld [vmem:[%s3477_s1 + $0x968] sm:$0xff] }
  0x8c   : > { %1770 = vmatpush1.bf16.msra.mxu1 %v1769_v14  ;;  %1580 = vmatprep.subr.bf16.mxu0 %v1579_v15  ;;  %v530_v14 = vld [vmem:[%s3477_s1 + $0x958] sm:$0xff]  ;;  %v1599_v20 = vpack.c.bf16 %v532_v13, %v528_v12  ;;  %v572_v12 = vld [vmem:[%s3477_s1 + $0xaa8] sm:$0xff] }
  0x8d   : > { %1772 = vmatprep.subr.bf16.mxu1 %v1771_v19  ;;  %v534_v15 = vld [vmem:[%s3477_s1 + $0x978] sm:$0xff]  ;;  %v1789_v19 = vpack.c.bf16 %v525_v11, %v521_v9  ;;  %v568_v11 = vld [vmem:[%s3477_s1 + $0xa88] sm:$0xff] }
  0x8e   : > { %797 = vmatmul.mubr.f32.vlgmr.msra.gmra.mrb[0].mxu0 %v203_v25  ;;  %v1791_v24 = vpack.c.bf16 %v534_v15, %v530_v14  ;;  %v570_v13 = vld [vmem:[%s3477_s1 + $0xa98] sm:$0xff] }
  0x8f   : > { %1582 = vmatpush1.bf16.msra.mxu0 %v1581_v26  ;;  %1082 = vmatmul.mubr.f32.vlgmr.msra.gmra.mrb[0].mxu1 %v203_v25  ;;  %v533_v25 = vld [vmem:[%s3477_s1 + $0x970] sm:$0xff]  ;;  %v536_v26 = vld [vmem:[%s3477_s1 + $0x988] sm:$0xff]  ;;  %v574_v14 = vld [vmem:[%s3477_s1 + $0xab8] sm:$0xff] }
  0x90   : > { %1774 = vmatpush1.bf16.msra.mxu1 %v1773_v27  ;;  %1584 = vmatprep.subr.bf16.mxu0 %v1583_v28  ;;  %v540_v27 = vld [vmem:[%s3477_s1 + $0x9a8] sm:$0xff]  ;;  %v538_v28 = vld [vmem:[%s3477_s1 + $0x998] sm:$0xff]  ;;  %v1811_v21 = vpack.c.bf16 %v574_v14, %v570_v13  ;;  %v607_v14 = vld [vmem:[%s3477_s1 + $0xbc0] sm:$0xff] }
  0x91   : > { %1776 = vmatprep.subr.bf16.mxu1 %v1775_v32  ;;  %802 = vmatprep.mubr.f32.mxu0 %v210_v38  ;;  %v1793_v32 = vpack.c.bf16 %v533_v25, %v529_v23  ;;  %v1603_v33 = vpack.c.bf16 %v540_v27, %v536_v26  ;;  %v1795_v37 = vpack.c.bf16 %v542_v29, %v538_v28  ;;  %v576_v23 = vld [vmem:[%s3477_s1 + $0xac8] sm:$0xff]  ;;  %v578_v25 = vld [vmem:[%s3477_s1 + $0xad8] sm:$0xff] }
  0x92   : > { %1087 = vmatprep.mubr.f32.mxu1 %v210_v38  ;;  %803 = vmatmul.mubr.f32.gmra.mrb[2].mxu0 %v209_v40  ;;  %v541_v38 = vld [vmem:[%s3477_s1 + $0x9b0] sm:$0xff]  ;;  %v582_v26 = vld [vmem:[%s3477_s1 + $0xaf8] sm:$0xff] }
  0x93   : > { %1586 = vmatpush1.bf16.msra.mxu0 %v1585_v39  ;;  %1088 = vmatmul.mubr.f32.gmra.mrb[2].mxu1 %v209_v40  ;;  %v544_v39 = vld [vmem:[%s3477_s1 + $0x9c8] sm:$0xff]  ;;  %v1797_v44 = vpack.c.bf16 %v541_v38, %v537_v36  ;;  %v590_v38 = vld [vmem:[%s3477_s1 + $0xb38] sm:$0xff] }
  0x94   : > { %1778 = vmatpush1.bf16.msra.mxu1 %v1777_v41  ;;  %1588 = vmatprep.subr.bf16.mxu0 %v1587_v42  ;;  %v548_v40 = vld [vmem:[%s3477_s1 + $0x9e8] sm:$0xff]  ;;  %v546_v41 = vld [vmem:[%s3477_s1 + $0x9d8] sm:$0xff] }
  0x95   : > { %1780 = vmatprep.subr.bf16.mxu1 %v1779_v46  ;;  %808 = vmatprep.mubr.f32.mxu0 %v216_v52  ;;  %v550_v42 = vld [vmem:[%s3477_s1 + $0x9f8] sm:$0xff]  ;;  %v1607_v45 = vpack.c.bf16 %v548_v40, %v544_v39  ;;  %v543_v46 = vld [vmem:[%s3477_s1 + $0x9c0] sm:$0xff]  ;;  %v588_v36 = vld [vmem:[%s3477_s1 + $0xb28] sm:$0xff] }
  0x96   : > { %1093 = vmatprep.mubr.f32.mxu1 %v216_v52  ;;  %809 = vmatmul.mubr.f32.gmra.mrb[4].mxu0 %v215_v54  ;;  %v1799_v49 = vpack.c.bf16 %v550_v42, %v546_v41  ;;  %v556_v52 = vld [vmem:[%s3477_s1 + $0xa28] sm:$0xff]  ;;  %v1627_v41 = vpack.c.bf16 %v588_v36, %v584_v35  ;;  %v583_v42 = vld [vmem:[%s3477_s1 + $0xb00] sm:$0xff] }
  0x97   : > { %1590 = vmatpush1.bf16.msra.mxu0 %v1589_v53  ;;  %1094 = vmatmul.mubr.f32.gmra.mrb[4].mxu1 %v215_v54  ;;  %v554_v53 = vld [vmem:[%s3477_s1 + $0xa18] sm:$0xff]  ;;  %v1611_v57 = vpack.c.bf16 %v556_v52, %v552_v51 }
  0x98   : > { %1782 = vmatpush1.bf16.msra.mxu1 %v1781_v55  ;;  %1592 = vmatprep.subr.bf16.mxu0 %v1591_v56  ;;  %v558_v54 = vld [vmem:[%s3477_s1 + $0xa38] sm:$0xff]  ;;  %v1609_v55 = vpack.c.bf16 %v547_v47, %v543_v46  ;;  %v1801_v56 = vpack.c.bf16 %v549_v50, %v545_v48  ;;  %v589_v46 = vld [vmem:[%s3477_s1 + $0xb30] sm:$0xff]  ;;  %v592_v47 = vld [vmem:[%s3477_s1 + $0xb48] sm:$0xff] }
  0x99   : > { %1784 = vmatprep.subr.bf16.mxu1 %v1783_v60  ;;  %814 = vmatprep.mubr.f32.mxu0 %v222_v2  ;;  %v553_v60 = vld [vmem:[%s3477_s1 + $0xa10] sm:$0xff]  ;;  %v1803_v61 = vpack.c.bf16 %v558_v54, %v554_v53  ;;  %v596_v48 = vld [vmem:[%s3477_s1 + $0xb68] sm:$0xff]  ;;  %v598_v50 = vld [vmem:[%s3477_s1 + $0xb78] sm:$0xff] }
  0x9a   : > { %1099 = vmatprep.mubr.f32.mxu1 %v222_v2  ;;  %815 = vmatmul.mubr.f32.gmra.mrb[6].mxu0 %v221_v4  ;;  %v566_v2 = vld [vmem:[%s3477_s1 + $0xa78] sm:$0xff]  ;;  %v1631_v53 = vpack.c.bf16 %v596_v48, %v592_v47  ;;  %v591_v54 = vld [vmem:[%s3477_s1 + $0xb40] sm:$0xff] }
  0x9b   : > { %1594 = vmatpush1.bf16.msra.mxu0 %v1593_v3  ;;  %1100 = vmatmul.mubr.f32.gmra.mrb[6].mxu1 %v221_v4  ;;  %v1613_v3 = vpack.c.bf16 %v555_v59, %v551_v58  ;;  %v1805_v4 = vpack.c.bf16 %v557_v62, %v553_v60  ;;  %v1807_v9 = vpack.c.bf16 %v566_v2, %v562_v1  ;;  %v597_v58 = vld [vmem:[%s3477_s1 + $0xb70] sm:$0xff]  ;;  %v600_v59 = vld [vmem:[%s3477_s1 + $0xb88] sm:$0xff]  ;;  %v606_v62 = vld [vmem:[%s3477_s1 + $0xbb8] sm:$0xff] }
  0x9c   : > { %1786 = vmatpush1.bf16.msra.mxu1 %v1785_v5  ;;  %1596 = vmatprep.subr.bf16.mxu0 %v1595_v6  ;;  %v1615_v5 = vpack.c.bf16 %v564_v0, %v560_v63  ;;  %v559_v6 = vld [vmem:[%s3477_s1 + $0xa40] sm:$0xff]  ;;  %v604_v60 = vld [vmem:[%s3477_s1 + $0xba8] sm:$0xff] }
  0x9d   : > { %1788 = vmatprep.subr.bf16.mxu1 %v1787_v10  ;;  %820 = vmatprep.mubr.f32.mxu0 %v228_v16  ;;  %v565_v10 = vld [vmem:[%s3477_s1 + $0xa70] sm:$0xff]  ;;  %v1617_v15 = vpack.c.bf16 %v563_v7, %v559_v6  ;;  %v1635_v1 = vpack.c.bf16 %v604_v60, %v600_v59  ;;  %v599_v2 = vld [vmem:[%s3477_s1 + $0xb80] sm:$0xff]  ;;  %v608_v7 = vld [vmem:[%s3477_s1 + $0xbc8] sm:$0xff] }
  0x9e   : > { %1105 = vmatprep.mubr.f32.mxu1 %v228_v16  ;;  %821 = vmatmul.mubr.f32.gmra.mrb[8].mxu0 %v227_v18  ;;  %v1809_v16 = vpack.c.bf16 %v565_v10, %v561_v8  ;;  %v605_v6 = vld [vmem:[%s3477_s1 + $0xbb0] sm:$0xff]  ;;  %v612_v8 = vld [vmem:[%s3477_s1 + $0xbe8] sm:$0xff]  ;;  %v614_v10 = vld [vmem:[%s3477_s1 + $0xbf8] sm:$0xff] }
  0x9f   : > { %1598 = vmatpush1.bf16.msra.mxu0 %v1597_v17  ;;  %1106 = vmatmul.mubr.f32.gmra.mrb[8].mxu1 %v227_v18  ;;  %v1619_v17 = vpack.c.bf16 %v572_v12, %v568_v11  ;;  %v567_v18 = vld [vmem:[%s3477_s1 + $0xa80] sm:$0xff]  ;;  %v1639_v13 = vpack.c.bf16 %v612_v8, %v608_v7 }
  0xa0   : > { %1790 = vmatpush1.bf16.msra.mxu1 %v1789_v19  ;;  %1600 = vmatprep.subr.bf16.mxu0 %v1599_v20  ;;  %v571_v19 = vld [vmem:[%s3477_s1 + $0xaa0] sm:$0xff]  ;;  %v569_v20 = vld [vmem:[%s3477_s1 + $0xa90] sm:$0xff] }
  0xa1   : > { %1792 = vmatprep.subr.bf16.mxu1 %v1791_v24  ;;  %891 = vmatprep.mubr.f32.mxu0 %v206_v30  ;;  %v580_v24 = vld [vmem:[%s3477_s1 + $0xae8] sm:$0xff]  ;;  %v1621_v27 = vpack.c.bf16 %v571_v19, %v567_v18  ;;  %v1813_v28 = vpack.c.bf16 %v573_v22, %v569_v20  ;;  %v613_v18 = vld [vmem:[%s3477_s1 + $0xbf0] sm:$0xff]  ;;  %v212_v22 = vld [vmem:[%s2416_s24 + $0x58] sm:$0xff] }
  0xa2   : > { %1176 = vmatprep.mubr.f32.mxu1 %v206_v30  ;;  %v1623_v29 = vpack.c.bf16 %v580_v24, %v576_v23  ;;  %v575_v30 = vld [vmem:[%s3477_s1 + $0xac0] sm:$0xff]  ;;  %v211_v23 = vld [vmem:[%s2416_s24 + $0x50] sm:$0xff]  ;;  %v218_v24 = vld [vmem:[%s2416_s24 + $0x88] sm:$0xff] }
  0xa3   : > { %1602 = vmatpush1.bf16.msra.mxu0 %v1601_v31  ;;  %v579_v31 = vld [vmem:[%s3477_s1 + $0xae0] sm:$0xff] }
  0xa4   : > { %1794 = vmatpush1.bf16.msra.mxu1 %v1793_v32  ;;  %1604 = vmatprep.subr.bf16.mxu0 %v1603_v33  ;;  %v577_v32 = vld [vmem:[%s3477_s1 + $0xad0] sm:$0xff]  ;;  %v1815_v33 = vpack.c.bf16 %v582_v26, %v578_v25  ;;  %v1625_v39 = vpack.c.bf16 %v579_v31, %v575_v30  ;;  %v217_v25 = vld [vmem:[%s2416_s24 + $0x80] sm:$0xff]  ;;  %v224_v26 = vld [vmem:[%s2416_s24 + $0xb8] sm:$0xff]  ;;  %v617_v30 = vlaneseq }
  0xa5   : > { %1796 = vmatprep.subr.bf16.mxu1 %v1795_v37  ;;  %v586_v37 = vld [vmem:[%s3477_s1 + $0xb18] sm:$0xff]  ;;  %v1817_v40 = vpack.c.bf16 %v581_v34, %v577_v32 }
  0xa6   : > { %v618_v31 = vshrl.u32 %v617_v30, 7 }
  0xa7   : > { %1606 = vmatpush1.bf16.msra.mxu0 %v1605_v43  ;;  %v587_v43 = vld [vmem:[%s3477_s1 + $0xb20] sm:$0xff] }
  0xa8   : > { %1798 = vmatpush1.bf16.msra.mxu1 %v1797_v44  ;;  %1608 = vmatprep.subr.bf16.mxu0 %v1607_v45  ;;  %v585_v44 = vld [vmem:[%s3477_s1 + $0xb10] sm:$0xff]  ;;  %v1819_v45 = vpack.c.bf16 %v590_v38, %v586_v37  ;;  %v1629_v51 = vpack.c.bf16 %v587_v43, %v583_v42  ;;  %v619_v32 = vsub.s32 0, %v618_v31  ;;  %v627_v34 = vsub.s32 2, %v618_v31 }
  0xa9   : > { %1800 = vmatprep.subr.bf16.mxu1 %v1799_v49  ;;  %v594_v49 = vld [vmem:[%s3477_s1 + $0xb58] sm:$0xff]  ;;  %v1821_v52 = vpack.c.bf16 %v589_v46, %v585_v44  ;;  %v623_v35 = vsub.s32 1, %v618_v31  ;;  %v631_v36 = vsub.s32 3, %v618_v31 }
  0xab   : > { %1610 = vmatpush1.bf16.msra.mxu0 %v1609_v55  ;;  %v595_v55 = vld [vmem:[%s3477_s1 + $0xb60] sm:$0xff] }
  0xac   : > { %1802 = vmatpush1.bf16.msra.mxu1 %v1801_v56  ;;  %1612 = vmatprep.subr.bf16.mxu0 %v1611_v57  ;;  %v593_v56 = vld [vmem:[%s3477_s1 + $0xb50] sm:$0xff]  ;;  %v1823_v57 = vpack.c.bf16 %v598_v50, %v594_v49  ;;  %v1633_v63 = vpack.c.bf16 %v595_v55, %v591_v54 }
  0xad   : > { %1804 = vmatprep.subr.bf16.mxu1 %v1803_v61  ;;  %v602_v61 = vld [vmem:[%s3477_s1 + $0xb98] sm:$0xff]  ;;  %v1825_v0 = vpack.c.bf16 %v597_v58, %v593_v56 }
  0xaf   : > { %1614 = vmatpush1.bf16.msra.mxu0 %v1613_v3  ;;  %v603_v3 = vld [vmem:[%s3477_s1 + $0xba0] sm:$0xff] }
  0xb0   : > { %1806 = vmatpush1.bf16.msra.mxu1 %v1805_v4  ;;  %1616 = vmatprep.subr.bf16.mxu0 %v1615_v5  ;;  %v601_v4 = vld [vmem:[%s3477_s1 + $0xb90] sm:$0xff]  ;;  %v1827_v5 = vpack.c.bf16 %v606_v62, %v602_v61  ;;  %v1637_v11 = vpack.c.bf16 %v603_v3, %v599_v2 }
  0xb1   : > { %1808 = vmatprep.subr.bf16.mxu1 %v1807_v9  ;;  %v610_v9 = vld [vmem:[%s3477_s1 + $0xbd8] sm:$0xff]  ;;  %v1829_v12 = vpack.c.bf16 %v605_v6, %v601_v4 }
  0xb3   : > { %1618 = vmatpush1.bf16.msra.mxu0 %v1617_v15  ;;  %v611_v15 = vld [vmem:[%s3477_s1 + $0xbe0] sm:$0xff] }
  0xb4   : > { %1810 = vmatpush1.bf16.msra.mxu1 %v1809_v16  ;;  %1620 = vmatprep.subr.bf16.mxu0 %v1619_v17  ;;  %v1831_v16 = vpack.c.bf16 %v614_v10, %v610_v9  ;;  %v609_v17 = vld [vmem:[%s3477_s1 + $0xbd0] sm:$0xff]  ;;  %v1641_v19 = vpack.c.bf16 %v611_v15, %v607_v14 }
  0xb5   : > { %1812 = vmatprep.subr.bf16.mxu1 %v1811_v21  ;;  %v1833_v20 = vpack.c.bf16 %v613_v18, %v609_v17  ;;  %v205_v21 = vld [vmem:[%s2416_s24 + $0x20] sm:$0xff] }
  0xb7   : > { %1622 = vmatpush1.bf16.msra.mxu0 %v1621_v27  ;;  %v223_v27 = vld [vmem:[%s2416_s24 + $0xb0] sm:$0xff] }
  0xb8   : > { %1814 = vmatpush1.bf16.msra.mxu1 %v1813_v28  ;;  %1624 = vmatprep.subr.bf16.mxu0 %v1623_v29  ;;  %v230_v28 = vld [vmem:[%s2416_s24 + $0xe8] sm:$0xff]  ;;  %v229_v29 = vld [vmem:[%s2416_s24 + $0xe0] sm:$0xff]  ;;  %s1235_s24 = ssub.s32 (%p2123_p4), 9, %s2308_s9 }
  0xb9   : > { %1816 = vmatprep.subr.bf16.mxu1 %v1815_v33  ;;  %v615_v33 = vld [vmem:[%s3478_s2] sm:$0xf]  ;;  %p1236_p8 = scmp.lt.s32.totalorder (%p2123_p4), %s1235_s24, 5 }
  0xba   : > { %v620_v37 = vrot.slane %v615_v33, %v619_v32  ;;  %v628_v38 = vrot.slane %v615_v33, %v627_v34 }
  0xbb   : > { %1626 = vmatpush1.bf16.msra.mxu0 %v1625_v39  ;;  %v624_v39 = vrot.slane %v615_v33, %v623_v35 }
  0xbc   : > { %1818 = vmatpush1.bf16.msra.mxu1 %v1817_v40  ;;  %1628 = vmatprep.subr.bf16.mxu0 %v1627_v41  ;;  %v632_v40 = vrot.slane %v615_v33, %v631_v36 }
  0xbd   : > { %1820 = vmatprep.subr.bf16.mxu1 %v1819_v45 }
  0xbf   : > { %1630 = vmatpush1.bf16.msra.mxu0 %v1629_v51 }
  0xc0   : > { %1822 = vmatpush1.bf16.msra.mxu1 %v1821_v52  ;;  %1632 = vmatprep.subr.bf16.mxu0 %v1631_v53 }
  0xc1   : > { %1824 = vmatprep.subr.bf16.mxu1 %v1823_v57 }
  0xc3   : > { %1634 = vmatpush1.bf16.msra.mxu0 %v1633_v63 }
  0xc4   : > { %1826 = vmatpush1.bf16.msra.mxu1 %v1825_v0  ;;  %1636 = vmatprep.subr.bf16.mxu0 %v1635_v1 }
  0xc5   : > { %1828 = vmatprep.subr.bf16.mxu1 %v1827_v5 }
  0xc7   : > { %1638 = vmatpush1.bf16.msra.mxu0 %v1637_v11 }
  0xc8   : > { %1830 = vmatpush1.bf16.msra.mxu1 %v1829_v12  ;;  %1640 = vmatprep.subr.bf16.mxu0 %v1639_v13 }
  0xc9   : > { %1832 = vmatprep.subr.bf16.mxu1 %v1831_v16 }
  0xcb   : > { %1642 = vmatpush1.bf16.msra.mxu0 %v1641_v19 }
  0xcc   : > { %1834 = vmatpush1.bf16.msra.mxu1 %v1833_v20 }
  0xce   : > { %892 = vmatmul.mubr.f32.vlgmr.msra.gmra.mrb[0].mxu0 %v205_v21 }
  0xcf   : > { %1177 = vmatmul.mubr.f32.vlgmr.msra.gmra.mrb[0].mxu1 %v205_v21  ;;  %897 = vmatprep.mubr.f32.mxu0 %v212_v22 }
  0xd0   : > { %1182 = vmatprep.mubr.f32.mxu1 %v212_v22 }
  0xd2   : > { %898 = vmatmul.mubr.f32.gmra.mrb[2].mxu0 %v211_v23 }
  0xd3   : > { %1183 = vmatmul.mubr.f32.gmra.mrb[2].mxu1 %v211_v23  ;;  %903 = vmatprep.mubr.f32.mxu0 %v218_v24 }
  0xd4   : > { %1188 = vmatprep.mubr.f32.mxu1 %v218_v24 }
  0xd6   : > { %904 = vmatmul.mubr.f32.gmra.mrb[4].mxu0 %v217_v25 }
  0xd7   : > { %1189 = vmatmul.mubr.f32.gmra.mrb[4].mxu1 %v217_v25  ;;  %909 = vmatprep.mubr.f32.mxu0 %v224_v26 }
  0xd8   : > { %1194 = vmatprep.mubr.f32.mxu1 %v224_v26 }
  0xda   : > { %910 = vmatmul.mubr.f32.gmra.mrb[6].mxu0 %v223_v27 }
  0xdb   : > { %1195 = vmatmul.mubr.f32.gmra.mrb[6].mxu1 %v223_v27  ;;  %915 = vmatprep.mubr.f32.mxu0 %v230_v28 }
  0xdc   : > { %1200 = vmatprep.mubr.f32.mxu1 %v230_v28 }
  0xde   : > { %916 = vmatmul.mubr.f32.gmra.mrb[8].mxu0 %v229_v29 }
  0xdf   : > { %1201 = vmatmul.mubr.f32.gmra.mrb[8].mxu1 %v229_v29 }
 0x1a1   : > { %v893_v41 = vpop.f32.mrb[0].mxu0 }
 0x1a2   : > { %v1835_v42 = vadd.f32 %v893_v41, %v620_v37  ;;  %v1178_v43 = vpop.f32.mrb[0].mxu1  ;;  %v895_v44 = vpop.f32.mrb[1].mxu0 }
 0x1a3   : > { %v1845_v45 = vadd.f32 %v1178_v43, %v628_v38  ;;  %v1836_v46 = vadd.f32 %v895_v44, %v624_v39  ;;  %v1180_v47 = vpop.f32.mrb[1].mxu1 }
 0x1a4   : > { %1207 = vst [vmem:[%s3328_s12] sm:$0xff] %v1835_v42  ;;  %v1846_v48 = vadd.f32 %v1180_v47, %v632_v40 }
 0x1a5   : > { %1209 = vst [vmem:[%s3328_s12 + $0x10] sm:$0xff] %v1845_v45  ;;  %1208 = vst [vmem:[%s3328_s12 + $0x8] sm:$0xff] %v1836_v46  ;;  %v899_v49 = vpop.f32.mrb[2].mxu0 }
 0x1a6   : > { %1210 = vst [vmem:[%s3328_s12 + $0x18] sm:$0xff] %v1846_v48  ;;  %v1837_v50 = vadd.f32 %v899_v49, %v620_v37  ;;  %v1184_v51 = vpop.f32.mrb[2].mxu1  ;;  %v901_v52 = vpop.f32.mrb[3].mxu0 }
 0x1a7   : > { %v1847_v53 = vadd.f32 %v1184_v51, %v628_v38  ;;  %v1838_v54 = vadd.f32 %v901_v52, %v624_v39  ;;  %v1186_v55 = vpop.f32.mrb[3].mxu1 }
 0x1a8   : > { %1211 = vst [vmem:[%s3328_s12 + $0x20] sm:$0xff] %v1837_v50  ;;  %v1848_v56 = vadd.f32 %v1186_v55, %v632_v40 }
 0x1a9   : > { %1213 = vst [vmem:[%s3328_s12 + $0x30] sm:$0xff] %v1847_v53  ;;  %1212 = vst [vmem:[%s3328_s12 + $0x28] sm:$0xff] %v1838_v54  ;;  %v905_v57 = vpop.f32.mrb[4].mxu0 }
 0x1aa   : > { %1214 = vst [vmem:[%s3328_s12 + $0x38] sm:$0xff] %v1848_v56  ;;  %v1839_v58 = vadd.f32 %v905_v57, %v620_v37  ;;  %v1190_v59 = vpop.f32.mrb[4].mxu1  ;;  %v907_v60 = vpop.f32.mrb[5].mxu0 }
 0x1ab   : > { %v1849_v61 = vadd.f32 %v1190_v59, %v628_v38  ;;  %v1840_v62 = vadd.f32 %v907_v60, %v624_v39  ;;  %v1192_v63 = vpop.f32.mrb[5].mxu1 }
 0x1ac   : > { %1215 = vst [vmem:[%s3328_s12 + $0x40] sm:$0xff] %v1839_v58  ;;  %v1850_v0 = vadd.f32 %v1192_v63, %v632_v40 }
 0x1ad   : > { %1217 = vst [vmem:[%s3328_s12 + $0x50] sm:$0xff] %v1849_v61  ;;  %1216 = vst [vmem:[%s3328_s12 + $0x48] sm:$0xff] %v1840_v62  ;;  %v911_v1 = vpop.f32.mrb[6].mxu0 }
 0x1ae   : > { %1218 = vst [vmem:[%s3328_s12 + $0x58] sm:$0xff] %v1850_v0  ;;  %v1841_v2 = vadd.f32 %v911_v1, %v620_v37  ;;  %v1196_v3 = vpop.f32.mrb[6].mxu1  ;;  %v913_v4 = vpop.f32.mrb[7].mxu0 }
 0x1af   : > { %v1851_v5 = vadd.f32 %v1196_v3, %v628_v38  ;;  %v1842_v6 = vadd.f32 %v913_v4, %v624_v39  ;;  %v1198_v7 = vpop.f32.mrb[7].mxu1 }
 0x1b0   : > { %1219 = vst [vmem:[%s3328_s12 + $0x60] sm:$0xff] %v1841_v2  ;;  %v1852_v8 = vadd.f32 %v1198_v7, %v632_v40  ;;  %1233 = sbr.rel (!%p2123_p4) target bundleno = 502 (0x1f6), region = 36 }
 0x1b1   : > { %1221 = vst [vmem:[%s3328_s12 + $0x70] sm:$0xff] %v1851_v5  ;;  %1220 = vst [vmem:[%s3328_s12 + $0x68] sm:$0xff] %v1842_v6  ;;  %v917_v9 = vpop.f32.mrb[8].mxu0 }
 0x1b2   : > { %1222 = vst [vmem:[%s3328_s12 + $0x78] sm:$0xff] %v1852_v8  ;;  %v1843_v10 = vadd.f32 %v917_v9, %v620_v37  ;;  %v1202_v11 = vpop.f32.mrb[8].mxu1  ;;  %v919_v12 = vpop.f32.mrb[9].mxu0 }
 0x1b3   : > { %v1853_v13 = vadd.f32 %v1202_v11, %v628_v38  ;;  %v1844_v14 = vadd.f32 %v919_v12, %v624_v39  ;;  %v1204_v15 = vpop.f32.mrb[9].mxu1 }
 0x1b4   : > { %1223 = vst [vmem:[%s3328_s12 + $0x80] sm:$0xff] %v1843_v10  ;;  %v1854_v16 = vadd.f32 %v1204_v15, %v632_v40 }
 0x1b5   : > { %1225 = vst [vmem:[%s3328_s12 + $0x90] sm:$0xff] %v1853_v13  ;;  %1224 = vst [vmem:[%s3328_s12 + $0x88] sm:$0xff] %v1844_v14 }
 0x1b6   : > { %1226 = vst [vmem:[%s3328_s12 + $0x98] sm:$0xff] %v1854_v16 }
 0x1b7   : > { %s3490_s24 = smov (!%p1236_p8, %s1235_s24), 5 }
 0x1b8   : > { %s1447_s30 = sshll.u32 %s3490_s24, 9 }
 0x1b9   : > { %p1438_p9 = scmp.eq.s32.totalorder %s1447_s30, 0 }
 0x1ba   : > { %1986 = sdivrem.u32 (!%p1438_p9), %s3490_s24, 5 }
 0x1bb   : > { %1246 = sbr.rel (%p1438_p9) target bundleno = 502 (0x1f6), region = 40 }
 0x1c3   : > { %s3363_s20 = spop.drf %1986 }
 0x1c4   : > { %p1439_p10 = scmp.le.s32.totalorder %s3363_s20, 0 }
 0x1c5   : > { %s3481_s15 = smov (!%p1439_p10), %s3357_s29  ;;  %s3482_s9 = smov (!%p1439_p10), %s3328_s12 }
 0x1c6   : > { %1384 = sbr.rel (%p1439_p10) target bundleno = 473 (0x1d9), region = 88  ;;  %s3372_s4 = smov (!%p1439_p10), 0  }
 0x1c7   : > { %s3374_s5 = smov (!%p1439_p10), 0  }
 0x1cd LB: >> { %v1260_v17 = vld [vmem:[%s2052_s9] sm:$0xff]  ;;  %s1300_s25 = sadd.s32 1, %s2056_s4  ;;  %v1270_v22 = vld [vmem:[%s2052_s9 + $0x8] sm:$0xff]  ;;  %v1280_v27 = vld [vmem:[%s2052_s9 + $0x10] sm:$0xff]  ;;  %s1254_s5 = sadd.s32 1, %s2060_s5   ;;  %s2060_s5 = sphi %s3374_s5, %s1254_s5   ;;  %s2056_s4 = sphi %s3372_s4, %s3483_s4   ;;  %s2052_s9 = sphi %s3482_s9, %s1305_s9   ;;  %s2048_s15 = sphi %s3481_s15, %s1306_s15  }
 0x1ce   : >> { %v1262_v18 = vld [vmem:[%s2052_s9 + $0x20] sm:$0xff]  ;;  %1261 = vst [vmem:[%s2048_s15] sm:$0xff] %v1260_v17  ;;  %p1301_p11 = scmp.ge.s32.totalorder %s1300_s25, %s3363_s20  ;;  %1271 = vst [vmem:[%s2048_s15 + $0x8] sm:$0xff] %v1270_v22  ;;  %v1272_v23 = vld [vmem:[%s2052_s9 + $0x28] sm:$0xff]  ;;  %p1253_p12 = scmp.ge.s32.totalorder %s1254_s5, %s3363_s20 }
 0x1cf   : >> { %v1264_v19 = vld [vmem:[%s2052_s9 + $0x40] sm:$0xff]  ;;  %1263 = vst [vmem:[%s2048_s15 + $0x20] sm:$0xff] %v1262_v18  ;;  %v1274_v24 = vld [vmem:[%s2052_s9 + $0x48] sm:$0xff]  ;;  %1273 = vst [vmem:[%s2048_s15 + $0x28] sm:$0xff] %v1272_v23 }
 0x1d0   : >> { %1265 = vst [vmem:[%s2048_s15 + $0x40] sm:$0xff] %v1264_v19  ;;  %v1266_v20 = vld [vmem:[%s2052_s9 + $0x60] sm:$0xff]  ;;  %v1276_v25 = vld [vmem:[%s2052_s9 + $0x68] sm:$0xff]  ;;  %1275 = vst [vmem:[%s2048_s15 + $0x48] sm:$0xff] %v1274_v24  ;;  %s3492_s25 = smov (%p1301_p11, %s1300_s25), 0 }
 0x1d1   : >> { %v1268_v21 = vld [vmem:[%s2052_s9 + $0x80] sm:$0xff]  ;;  %1267 = vst [vmem:[%s2048_s15 + $0x60] sm:$0xff] %v1266_v20  ;;  %1277 = vst [vmem:[%s2048_s15 + $0x68] sm:$0xff] %v1276_v25  ;;  %v1278_v26 = vld [vmem:[%s2052_s9 + $0x88] sm:$0xff]  ;;  %s1303_s28 = smul.u32 160, %s3492_s25  ;;  %s3483_s4 = smov %s3492_s25 }
 0x1d2   : >> { %1269 = vst [vmem:[%s2048_s15 + $0x80] sm:$0xff] %v1268_v21  ;;  %v1282_v28 = vld [vmem:[%s2052_s9 + $0x30] sm:$0xff]  ;;  %1279 = vst [vmem:[%s2048_s15 + $0x88] sm:$0xff] %v1278_v26  ;;  %v1290_v32 = vld [vmem:[%s2052_s9 + $0x18] sm:$0xff]  ;;  %1256 = sbr.rel (!%p1253_p12) target bundleno = 461 (0x1cd), region = 94 }
 0x1d3   : >> { %1281 = vst [vmem:[%s2048_s15 + $0x10] sm:$0xff] %v1280_v27  ;;  %1283 = vst [vmem:[%s2048_s15 + $0x30] sm:$0xff] %v1282_v28  ;;  %v1284_v29 = vld [vmem:[%s2052_s9 + $0x50] sm:$0xff]  ;;  %v1292_v33 = vld [vmem:[%s2052_s9 + $0x38] sm:$0xff] }
 0x1d4   : >> { %v1286_v30 = vld [vmem:[%s2052_s9 + $0x70] sm:$0xff]  ;;  %1285 = vst [vmem:[%s2048_s15 + $0x50] sm:$0xff] %v1284_v29  ;;  %v1294_v34 = vld [vmem:[%s2052_s9 + $0x58] sm:$0xff]  ;;  %1291 = vst [vmem:[%s2048_s15 + $0x18] sm:$0xff] %v1290_v32 }
 0x1d5   : >> { %v1288_v31 = vld [vmem:[%s2052_s9 + $0x90] sm:$0xff]  ;;  %1287 = vst [vmem:[%s2048_s15 + $0x70] sm:$0xff] %v1286_v30  ;;  %1293 = vst [vmem:[%s2048_s15 + $0x38] sm:$0xff] %v1292_v33  ;;  %v1296_v35 = vld [vmem:[%s2052_s9 + $0x78] sm:$0xff] }
 0x1d6   : >> { %1289 = vst [vmem:[%s2048_s15 + $0x90] sm:$0xff] %v1288_v31  ;;  %1295 = vst [vmem:[%s2048_s15 + $0x58] sm:$0xff] %v1294_v34  ;;  %v1298_v36 = vld [vmem:[%s2052_s9 + $0x98] sm:$0xff]  ;;  %s1305_s9 = scalar_lea.vmem %s3328_s12, %s1303_s28 [#allocation2]  }
 0x1d7   : >> { %1297 = vst [vmem:[%s2048_s15 + $0x78] sm:$0xff] %v1296_v35  ;;  %1299 = vst [vmem:[%s2048_s15 + $0x98] sm:$0xff] %v1298_v36  ;;  %s1306_s15 = scalar_lea.vmem %s3357_s29, %s1303_s28  }
 0x1d9 PF: > { %1988 = sdivrem.u32 %s3490_s24, 5 }
 0x1da   : > { %s1440_s6 = smul.u32 160, %s3363_s20 }
 0x1dc   : > { %s3442_s7 = scalar_lea.vmem %s3328_s12, %s1440_s6 [#allocation2]   ;;  %s3445_s8 = scalar_lea.vmem %s3357_s29, %s1440_s6  }
 0x1e2   : > { %s3447_s10 = spop.drf %1988 }
 0x1e3   : > { %p1442_p13 = scmp.le.s32.totalorder %s3447_s10, 0 }
 0x1e4   : > { %s3484_s11 = smov (!%p1442_p13), %s3445_s8  ;;  %s3485_s14 = smov (!%p1442_p13), %s3442_s7 }
 0x1e5   : > { %1398 = sbr.rel (%p1442_p13) target bundleno = 502 (0x1f6), region = 99  ;;  %s2070_s17 = smov (!%p1442_p13), 0  }
 0x1e6   : > { %s2074_s18 = smov (!%p1442_p13), 0  }
 0x1ec LB: >> { %v1323_v37 = vld [vmem:[%s2068_s14] sm:$0xff]  ;;  %v1325_v38 = vld [vmem:[%s2068_s14 + $0x8] sm:$0xff]  ;;  %v1327_v39 = vld [vmem:[%s2068_s14 + $0x10] sm:$0xff]  ;;  %s1331_s21 = sadd.s32 1, %s2072_s17  ;;  %s1317_s18 = sadd.s32 1, %s2076_s18   ;;  %s2076_s18 = sphi %s2074_s18, %s1317_s18   ;;  %s2072_s17 = sphi %s2070_s17, %s2071_s17   ;;  %s2068_s14 = sphi %s3485_s14, %s1336_s14   ;;  %s2064_s11 = sphi %s3484_s11, %s1337_s11  }
 0x1ed   : >> { %1324 = vst [vmem:[%s2064_s11] sm:$0xff] %v1323_v37  ;;  %1326 = vst [vmem:[%s2064_s11 + $0x8] sm:$0xff] %v1325_v38  ;;  %v1329_v40 = vld [vmem:[%s2068_s14 + $0x18] sm:$0xff]  ;;  %p1332_p0 = scmp.ge.s32.totalorder %s1331_s21, %s3447_s10  ;;  %p1316_p1 = scmp.ge.s32.totalorder %s1317_s18, %s3447_s10 }
 0x1ee   : >> { %1328 = vst [vmem:[%s2064_s11 + $0x10] sm:$0xff] %v1327_v39  ;;  %1330 = vst [vmem:[%s2064_s11 + $0x18] sm:$0xff] %v1329_v40 }
 0x1ef   : >> { %s3494_s21 = smov (%p1332_p0, %s1331_s21), 0  ;;  %1319 = sbr.rel (!%p1316_p1) target bundleno = 492 (0x1ec), region = 105 }
 0x1f0   : >> { %s1443_s22 = sshll.u32 %s3494_s21, 5  ;;  %s2071_s17 = smov %s3494_s21  }
 0x1f1   : >> { %s1336_s14 = scalar_lea.vmem %s3442_s7, %s1443_s22 [#allocation2]   ;;  %s1337_s11 = scalar_lea.vmem %s3445_s8, %s1443_s22  }
 0x1f6 PF: > { %p10_p2 = scmp.ge.s32.totalorder %s2113_s16, 4   ;;  %s3486_s12 = smov %s2040_s13 }
 0x1f7   : > { %s3487_s13 = smov %s2121_s19  ;;  %s3488_s14 = smov %s2113_s16 }
 0x1f8   :  { %12 = sbr.rel (!%p10_p2) target bundleno = 2 (0x2), region = 116 }

</bundles_post_ra>
